<compile_context>
chip_gen: v7x
topology: tpu7x:2x2x1
jax: 0.10.0
libtpu: 0.0.40
codegen_flags: <defaults>
</compile_context>

<pallas_src>
import functools

import jax
import jax.numpy as jnp
from jax.experimental import pallas as pl
from jax.experimental.pallas import tpu as pltpu


def _round_up(v, m):
    return (v + m - 1) // m * m


def _default_node_tile():
    # v5e/v6e (128 MiB VMEM): bigger node tiles (~86% of HBM roofline at 1024).
    # v7x (64 MiB VMEM) / unknown: keep 512 to leave room for buffers/accs.
    try:
        if pltpu.get_tpu_info().vmem_capacity_bytes >= (100 << 20):
            return 1024
    except Exception:
        pass
    return 512


def _vmem_budget_bytes(*, n_pad, tile, c_pad, widths, dtypes, cm_resident):
    """Estimate the kernel's VMEM need (bytes) and add headroom."""
    f32 = jnp.dtype(jnp.float32)
    total = 2 * (n_pad if cm_resident else tile) * 4          # cluster map
    mask_bytes = c_pad * tile * 4                              # f32 mask temp
    for dt in {jnp.dtype(d) for d in dtypes} - {f32}:
        mask_bytes += c_pad * tile * dt.itemsize               # extra mask dtypes
    total += mask_bytes
    for w, d in zip(widths, dtypes):
        isz = jnp.dtype(d).itemsize
        total += 2 * tile * w * isz                            # dbl-buffered input tile
        total += 2 * c_pad * w * isz                           # resident output block
        total += c_pad * w * 4                                 # f32 sum accumulator
    total += c_pad * 128 * 4                                   # count acc (lane-padded)
    total = int(total * 1.5) + (4 << 20)                       # Mosaic scratch / spills
    return max(32 << 20, min(total, 100 << 20))


# ----------------------------------------------------------------------------
# Fused Pallas kernel: segment mean of one or more [N, F_i] tensors -> [C, F_i]
# ----------------------------------------------------------------------------
def _scatter_mean_fused_kernel(cm_ref, *rest, num_feats, num_nodes, node_tile,
                               ragged, cm_resident):
    """One grid step processes one tile of nodes for ALL feature tensors.

    cm_ref    : resident (n_tiles, TN) int32 map, or streamed (TN,) per tile
    feat_refs : (TN, F_i)            node-feature tiles (F_i lane-dense, x128)
    out_refs  : (C_pad, F_i)         cluster features (resident across node axis)
    sum_refs  : (C_pad, F_i) f32     running per-cluster feature sums
    cnt_ref   : (C_pad, 1)   f32     running per-cluster element counts (shared)
    """
    feat_refs = rest[:num_feats]
    out_refs = rest[num_feats:2 * num_feats]
    sum_refs = rest[2 * num_feats:3 * num_feats]
    cnt_ref = rest[3 * num_feats]

    nt = pl.program_id(0)

    @pl.when(nt == 0)
    def _():
        for s in sum_refs:
            s[...] = jnp.zeros_like(s)
        cnt_ref[...] = jnp.zeros_like(cnt_ref)

    if cm_resident:
        cm = cm_ref[pl.ds(nt, 1), :]                   # (1, TN) int32
    else:
        cm = cm_ref[...].reshape(1, node_tile)         # streamed tile -> (1, TN)

    c_pad = cnt_ref.shape[0]
    # Regenerate the cluster-id iota in-register each step (near-free VPU op;
    # no VMEM scratch, no per-step vld stream).
    cid = jax.lax.broadcasted_iota(jnp.int32, (c_pad, node_tile), 0)
    mask = cm == cid                                   # (C_pad, TN) bool

    # f32 mask is used for the shared per-cluster counts (and for any f32 feat).
    mask_f32 = mask.astype(jnp.float32)
    cnt_ref[...] += jnp.sum(mask_f32, axis=1, keepdims=True)

    # One cast per distinct feature dtype, built directly from the bool mask.
    mask_by_dtype = {jnp.dtype(jnp.float32): mask_f32}
    for feat_ref in feat_refs:
        dt = jnp.dtype(feat_ref.dtype)
        if dt not in mask_by_dtype:
            mask_by_dtype[dt] = mask.astype(dt)

    if ragged:
        # Last node tile is partially out of bounds: zero undefined rows before
        # the MXU dot (0 * garbage may be NaN). Identity for full tiles.
        row = nt * node_tile + jax.lax.broadcasted_iota(
            jnp.int32, (node_tile, 1), 0)
        row_ok = row < num_nodes

    for feat_ref, sum_ref in zip(feat_refs, sum_refs):
        f = feat_ref[...]
        if ragged:
            f = jnp.where(row_ok, f, jnp.zeros_like(f))
        m = mask_by_dtype[jnp.dtype(feat_ref.dtype)]
        # Per-cluster feature sums via MXU matmul, native dtype, f32 accumulate.
        sum_ref[...] += jnp.dot(m, f, preferred_element_type=jnp.float32)

    @pl.when(nt == pl.num_programs(0) - 1)
    def _():
        # Clusters with zero members produce 0 (sum 0, count clamped to 1),
        # matching torch_scatter 'mean'. Exact divide: finalize-only cost.
        inv = 1.0 / jnp.maximum(cnt_ref[...], 1.0)
        for out_ref, sum_ref in zip(out_refs, sum_refs):
            out_ref[...] = (sum_ref[...] * inv).astype(out_ref.dtype)


def scatter_mean_pallas(feats, cluster_map, num_clusters, *, node_tile=None):
    """Fused segment-mean: out_i[c] = mean(feats_i[n] for cluster_map[n] == c).

    `feats` may be a single [N, F] array or a list/tuple of them (fused pass).
    Returns outputs of shape [num_clusters, F_i] in the input dtype(s).
    """
    single = not isinstance(feats, (list, tuple))
    if single:
        feats = [feats]
    feats = list(feats)
    n = feats[0].shape[0]
    for f in feats:
        assert f.shape[0] == n, "all feature tensors must share the node axis"

    if node_tile is None:
        node_tile = _default_node_tile()

    # Lane-dense feature widths: pad F_i up to a multiple of 128 (zeros, sliced
    # off after) so accumulator stores / MXU output are unmasked full vregs.
    orig_widths = [f.shape[1] for f in feats]
    feats_p = []
    for f in feats:
        fp = _round_up(f.shape[1], 128)
        if fp != f.shape[1]:
            f = jnp.pad(f, ((0, 0), (0, fp - f.shape[1])))
        feats_p.append(f)
    widths = [f.shape[1] for f in feats_p]
    dtypes = [f.dtype for f in feats_p]

    # Pad cluster count to a sublane-aligned row count (8 for 4B, 16 for 2B).
    min_sublanes = max(8 * 4 // jnp.dtype(d).itemsize for d in dtypes)
    c_pad = _round_up(max(int(num_clusters), 1), min_sublanes)

    # Node tiling: big tiles to amortize per-step overhead; clamp for small
    # graphs. The node axis of the FEATURES is NOT padded (no extra HBM pass);
    # the ragged last tile is masked in-kernel.
    tile = min(node_tile, _round_up(n, 128))
    n_pad = _round_up(n, tile)
    n_tiles = n_pad // tile
    ragged = (n_pad != n)

    # Cheap 1-D sentinel padding of the cluster map only: pad ids are -1 so pad
    # rows never match the (>= 0) cluster iota -> contribute to neither sums
    # nor counts.
    cm = cluster_map.astype(jnp.int32)
    if ragged:
        cm = jnp.concatenate([cm, jnp.full((n_pad - n,), -1, jnp.int32)])

    # Keep the cluster map fully VMEM-resident only while it is small; for
    # large N stream it per node tile (tiny DMA hidden behind feature DMA).
    cm_resident = (n_pad * 4) <= (2 << 20)
    if cm_resident:
        cm_arr = cm.reshape(n_tiles, tile)
        cm_spec = pl.BlockSpec((n_tiles, tile), lambda t: (0, 0))
    else:
        cm_arr = cm
        cm_spec = pl.BlockSpec((tile,), lambda t: (t,))

    num_feats = len(feats_p)
    kernel = functools.partial(
        _scatter_mean_fused_kernel,
        num_feats=num_feats, num_nodes=n, node_tile=tile,
        ragged=ragged, cm_resident=cm_resident)

    in_specs = [cm_spec]
    in_specs += [pl.BlockSpec((tile, w), lambda t: (t, 0)) for w in widths]
    out_specs = tuple(pl.BlockSpec((c_pad, w), lambda t: (0, 0)) for w in widths)
    out_shapes = tuple(jax.ShapeDtypeStruct((c_pad, w), d)
                       for w, d in zip(widths, dtypes))
    scratch = [pltpu.VMEM((c_pad, w), jnp.float32) for w in widths]
    scratch += [pltpu.VMEM((c_pad, 1), jnp.float32)]          # shared counts

    vmem_bytes = _vmem_budget_bytes(
        n_pad=n_pad, tile=tile, c_pad=c_pad, widths=widths, dtypes=dtypes,
        cm_resident=cm_resident)

    outs = pl.pallas_call(
        kernel,
        out_shape=out_shapes,
        grid_spec=pltpu.PrefetchScalarGridSpec(
            num_scalar_prefetch=0,
            grid=(n_tiles,),
            in_specs=in_specs,
            out_specs=out_specs,
            scratch_shapes=scratch,
        ),
        compiler_params=pltpu.CompilerParams(
            dimension_semantics=("arbitrary",),               # node axis = reduction
            vmem_limit_bytes=vmem_bytes,
        ),
    )(cm_arr, *feats_p)

    # Drop cluster-row padding and feature-width padding.
    outs = [o[:num_clusters, :w] for o, w in zip(outs, orig_widths)]
    return outs[0] if single else list(outs)


# ----------------------------------------------------------------------------
# ClusterPooling.forward equivalent
# ----------------------------------------------------------------------------
class ClusterPooling:
    def __init__(self, target, reduction="mean"):
        assert reduction == "mean", "only 'mean' reduction implemented"
        self.target = target
        self.reduction = reduction
        self.pos_cache = None
        self.batch_cache = None

    def forward(self, data):
        """`data` is a dict mimicking a torch_geometric Data object."""
        self.pos_cache = data["pos"]
        self.batch_cache = data.get("batch", None)

        t = str(self.target)
        cluster_map = data[f"scale{t}_cluster_map"].astype(jnp.int32)
        sample_index = data[f"scale{t}_sample_index"].astype(jnp.int32)
        num_clusters = int(data[f"scale{t}_num_clusters"])

        # hot path: segment-mean(s) fused into one Pallas call
        if "h" in data and data["h"] is not None:
            x_out, h_out = scatter_mean_pallas(
                [data["x"], data["h"]], cluster_map, num_clusters)
            data["x"], data["h"] = x_out, h_out
        else:
            data["x"] = scatter_mean_pallas(data["x"], cluster_map, num_clusters)

        # indexing glue (gathers / relabel) in plain JAX
        data["pos"] = data["pos"][sample_index]
        data["edge_index"] = data[f"scale{t}_edge_index"]
        if "batch" in data and data["batch"] is not None:
            data["batch"] = data["batch"][sample_index]
        if "edge_align" in data:
            data["edge_align"] = data[f"scale{t}_edge_align"]
        # TODO(synk): unpool() path (index_select expand + caches) not needed for forward.
        return data


# ----------------------------------------------------------------------------
# Reference (plain JAX) for validation
# ----------------------------------------------------------------------------
def scatter_mean_ref(x, cluster_map, num_clusters):
    sums = jax.ops.segment_sum(x.astype(jnp.float32), cluster_map,
                               num_segments=num_clusters)
    cnts = jax.ops.segment_sum(jnp.ones((x.shape[0],), jnp.float32), cluster_map,
                               num_segments=num_clusters)
    return (sums / jnp.maximum(cnts, 1.0)[:, None]).astype(x.dtype)


if __name__ == "__main__":
    key = jax.random.PRNGKey(0)
    k1, k2, k3, k4, k5 = jax.random.split(key, 5)

    # N deliberately NOT a tile multiple (exercises the in-kernel ragged-tile
    # mask + multi-tile grid); H=64 exercises feature-width lane padding and
    # the bf16-native MXU path; C=13 exercises cluster-row padding.
    N, F, C, H = 1100, 128, 13, 64
    target = 1

    x = jax.random.normal(k1, (N, F), dtype=jnp.float32)
    h = jax.random.normal(k2, (N, H), dtype=jnp.float32).astype(jnp.bfloat16)
    pos = jax.random.normal(k3, (N, 3), dtype=jnp.float32)
    batch = jnp.concatenate([jnp.zeros(N // 2, jnp.int32), jnp.ones(N - N // 2, jnp.int32)])
    cluster_map = jax.random.randint(k4, (N,), 0, C, dtype=jnp.int32)
    sample_index = jax.random.permutation(k5, N)[:C].astype(jnp.int32)
    coarse_edge_index = jnp.stack(
        [jnp.arange(C, dtype=jnp.int32), (jnp.arange(C, dtype=jnp.int32) + 1) % C])
    fine_edge_index = jnp.stack(
        [jnp.arange(N, dtype=jnp.int32), (jnp.arange(N, dtype=jnp.int32) + 1) % N])

    data = {
        "x": x,
        "h": h,
        "pos": pos,
        "batch": batch,
        "edge_index": fine_edge_index,
        f"scale{target}_cluster_map": cluster_map,
        f"scale{target}_sample_index": sample_index,
        f"scale{target}_edge_index": coarse_edge_index,
        f"scale{target}_num_clusters": C,
    }

    pool = ClusterPooling(target=target, reduction="mean")
    out = pool.forward(dict(data))
    jax.block_until_ready(out["x"])
    jax.block_until_ready(out["h"])

    # sanity check against pure-JAX reference
    ref_x = scatter_mean_ref(x, cluster_map, C)
    ref_h = scatter_mean_ref(h, cluster_map, C)
    assert out["x"].shape == (C, F)
    assert out["h"].shape == (C, H)
    assert out["pos"].shape == (C, 3)
    assert out["batch"].shape == (C,)
    assert jnp.allclose(out["x"], ref_x, atol=1e-4, rtol=1e-4)
    assert jnp.allclose(out["h"].astype(jnp.float32), ref_h.astype(jnp.float32),
                        atol=2e-2, rtol=2e-2)
    assert jnp.array_equal(out["pos"], pos[sample_index])
    assert jnp.array_equal(out["batch"], batch[sample_index])

    print("KERNEL_OK")
</pallas_src>

<mosaic_0001>
module attributes {stable_mosaic.version = 11 : i64} {
  func.func @_scatter_mean_fused_kernel(%arg0: i32, %arg1: memref<3x512xi32, #tpu.memory_space<vmem>>, %arg2: memref<512x128xf32, #tpu.memory_space<vmem>>, %arg3: memref<512x128xbf16, #tpu.memory_space<vmem>>, %arg4: memref<16x128xf32, #tpu.memory_space<vmem>>, %arg5: memref<16x128xbf16, #tpu.memory_space<vmem>>, %arg6: memref<16x128xf32, #tpu.memory_space<vmem>>, %arg7: memref<16x128xf32, #tpu.memory_space<vmem>>, %arg8: memref<16x1xf32, #tpu.memory_space<vmem>>) attributes {dimension_semantics = [#tpu.dimension_semantics<arbitrary>], iteration_bounds = array<i64: 3>, scalar_prefetch = 0 : i64, scratch_operands = 3 : i64, tpu.core_type = #tpu.core_type<tc>, window_params = [{pipeline_mode = #tpu.pipeline_mode<synchronous>, transform_indices = @transform_0, window_bounds = array<i64: 3, 512>}, {transform_indices = @transform_1, window_bounds = array<i64: 512, 128>}, {transform_indices = @transform_2, window_bounds = array<i64: 512, 128>}, {pipeline_mode = #tpu.pipeline_mode<synchronous>, transform_indices = @transform_3, window_bounds = array<i64: 16, 128>}, {pipeline_mode = #tpu.pipeline_mode<synchronous>, transform_indices = @transform_4, window_bounds = array<i64: 16, 128>}]} {
    %c0_i32 = arith.constant 0 : i32
    %0 = arith.cmpi eq, %arg0, %c0_i32 : i32
    %1 = arith.extui %0 : i1 to i32
    %c0_i32_0 = arith.constant 0 : i32
    %2 = arith.cmpi ne, %1, %c0_i32_0 : i32
    scf.if %2 {
      %cst_22 = arith.constant 0.000000e+00 : f32
      %45 = vector.broadcast %cst_22 : f32 to vector<16x128xf32>
      %c0_23 = arith.constant 0 : index
      %c0_24 = arith.constant 0 : index
      %46 = vector.load %arg6[%c0_23, %c0_24] : memref<16x128xf32, #tpu.memory_space<vmem>>, vector<16x128xf32>
      tpu.vector_store %arg6[%c0_23, %c0_24], %45 {strides = array<i32>} : memref<16x128xf32, #tpu.memory_space<vmem>>, vector<16x128xf32>,
      %cst_25 = arith.constant 0.000000e+00 : f32
      %47 = vector.broadcast %cst_25 : f32 to vector<16x128xf32>
      %c0_26 = arith.constant 0 : index
      %c0_27 = arith.constant 0 : index
      %48 = vector.load %arg7[%c0_26, %c0_27] : memref<16x128xf32, #tpu.memory_space<vmem>>, vector<16x128xf32>
      tpu.vector_store %arg7[%c0_26, %c0_27], %47 {strides = array<i32>} : memref<16x128xf32, #tpu.memory_space<vmem>>, vector<16x128xf32>,
      %cst_28 = arith.constant 0.000000e+00 : f32
      %49 = vector.broadcast %cst_28 : f32 to vector<16x1xf32>
      %c0_29 = arith.constant 0 : index
      %c0_30 = arith.constant 0 : index
      %50 = vector.load %arg8[%c0_29, %c0_30] : memref<16x1xf32, #tpu.memory_space<vmem>>, vector<16x1xf32>
      tpu.vector_store %arg8[%c0_29, %c0_30], %49 {strides = array<i32>} : memref<16x1xf32, #tpu.memory_space<vmem>>, vector<16x1xf32>,
    } else {
    }
    %3 = arith.index_cast %arg0 : i32 to index
    %c0 = arith.constant 0 : index
    %4 = vector.load %arg1[%3, %c0] : memref<3x512xi32, #tpu.memory_space<vmem>>, vector<1x512xi32>
    %5 = tpu.iota {dimensions = array<i32: 0>} : vector<16x512xi32>
    %6 = vector.broadcast %4 : vector<1x512xi32> to vector<16x512xi32>
    %7 = arith.cmpi eq, %6, %5 : vector<16x512xi32>
    %8 = arith.extui %7 : vector<16x512xi1> to vector<16x512xi32>
    %9 = arith.sitofp %8 : vector<16x512xi32> to vector<16x512xf32>
    %c0_1 = arith.constant 0 : index
    %c0_2 = arith.constant 0 : index
    %10 = vector.load %arg8[%c0_1, %c0_2] : memref<16x1xf32, #tpu.memory_space<vmem>>, vector<16x1xf32>
    %cst = arith.constant dense<0.000000e+00> : vector<16xf32>
    %11 = vector.multi_reduction <add>, %9, %cst [1] : vector<16x512xf32> to vector<16xf32>
    %12 = vector.shape_cast %11 : vector<16xf32> to vector<16x1xf32>
    %13 = arith.addf %10, %12 : vector<16x1xf32>
    %c0_3 = arith.constant 0 : index
    %c0_4 = arith.constant 0 : index
    %14 = vector.load %arg8[%c0_3, %c0_4] : memref<16x1xf32, #tpu.memory_space<vmem>>, vector<16x1xf32>
    tpu.vector_store %arg8[%c0_3, %c0_4], %13 {strides = array<i32>} : memref<16x1xf32, #tpu.memory_space<vmem>>, vector<16x1xf32>,
    %15 = arith.extui %7 : vector<16x512xi1> to vector<16x512xi32>
    %16 = arith.sitofp %15 : vector<16x512xi32> to vector<16x512xf32>
    %17 = arith.truncf %16 : vector<16x512xf32> to vector<16x512xbf16>
    %c512_i32 = arith.constant 512 : i32
    %18 = arith.muli %arg0, %c512_i32 : i32
    %19 = tpu.iota {dimensions = array<i32: 0>} : vector<512x1xi32>
    %20 = vector.broadcast %18 : i32 to vector<512x1xi32>
    %21 = arith.addi %20, %19 : vector<512x1xi32>
    %c1100_i32 = arith.constant 1100 : i32
    %22 = vector.broadcast %c1100_i32 : i32 to vector<512x1xi32>
    %23 = arith.cmpi slt, %21, %22 : vector<512x1xi32>
    %c0_5 = arith.constant 0 : index
    %c0_6 = arith.constant 0 : index
    %24 = vector.load %arg2[%c0_5, %c0_6] : memref<512x128xf32, #tpu.memory_space<vmem>>, vector<512x128xf32>
    %cst_7 = arith.constant 0.000000e+00 : f32
    %25 = vector.broadcast %cst_7 : f32 to vector<512x128xf32>
    %26 = vector.shape_cast %23 : vector<512x1xi1> to vector<512x1xi1>
    %27 = vector.broadcast %26 : vector<512x1xi1> to vector<512x128xi1>
    %28 = arith.select %27, %24, %25 : vector<512x128xi1>, vector<512x128xf32>
    %c0_8 = arith.constant 0 : index
    %c0_9 = arith.constant 0 : index
    %29 = vector.load %arg6[%c0_8, %c0_9] : memref<16x128xf32, #tpu.memory_space<vmem>>, vector<16x128xf32>
    %cst_10 = arith.constant dense<0.000000e+00> : vector<16x128xf32>
    %30 = tpu.matmul %9, %28, %cst_10 {dimension_numbers = #tpu.dot_dimension_numbers<[1], [0], [0], [1], [0, 0, 1, 1], [], []>} : vector<16x512xf32>, vector<512x128xf32>, vector<16x128xf32> -> vector<16x128xf32>
    %31 = arith.addf %29, %30 : vector<16x128xf32>
    %c0_11 = arith.constant 0 : index
    %c0_12 = arith.constant 0 : index
    %32 = vector.load %arg6[%c0_11, %c0_12] : memref<16x128xf32, #tpu.memory_space<vmem>>, vector<16x128xf32>
    tpu.vector_store %arg6[%c0_11, %c0_12], %31 {strides = array<i32>} : memref<16x128xf32, #tpu.memory_space<vmem>>, vector<16x128xf32>,
    %c0_13 = arith.constant 0 : index
    %c0_14 = arith.constant 0 : index
    %33 = vector.load %arg3[%c0_13, %c0_14] : memref<512x128xbf16, #tpu.memory_space<vmem>>, vector<512x128xbf16>
    %cst_15 = arith.constant 0.000000e+00 : bf16
    %34 = vector.broadcast %cst_15 : bf16 to vector<512x128xbf16>
    %35 = vector.shape_cast %23 : vector<512x1xi1> to vector<512x1xi1>
    %36 = vector.broadcast %35 : vector<512x1xi1> to vector<512x128xi1>
    %37 = arith.select %36, %33, %34 : vector<512x128xi1>, vector<512x128xbf16>
    %c0_16 = arith.constant 0 : index
    %c0_17 = arith.constant 0 : index
    %38 = vector.load %arg7[%c0_16, %c0_17] : memref<16x128xf32, #tpu.memory_space<vmem>>, vector<16x128xf32>
    %cst_18 = arith.constant dense<0.000000e+00> : vector<16x128xf32>
    %39 = tpu.matmul %17, %37, %cst_18 {dimension_numbers = #tpu.dot_dimension_numbers<[1], [0], [0], [1], [0, 0, 1, 1], [], []>} : vector<16x512xbf16>, vector<512x128xbf16>, vector<16x128xf32> -> vector<16x128xf32>
    %40 = arith.addf %38, %39 : vector<16x128xf32>
    %c0_19 = arith.constant 0 : index
    %c0_20 = arith.constant 0 : index
    %41 = vector.load %arg7[%c0_19, %c0_20] : memref<16x128xf32, #tpu.memory_space<vmem>>, vector<16x128xf32>
    tpu.vector_store %arg7[%c0_19, %c0_20], %40 {strides = array<i32>} : memref<16x128xf32, #tpu.memory_space<vmem>>, vector<16x128xf32>,
    %c2_i32 = arith.constant 2 : i32
    %42 = arith.cmpi eq, %arg0, %c2_i32 : i32
    %43 = arith.extui %42 : i1 to i32
    %c0_i32_21 = arith.constant 0 : i32
    %44 = arith.cmpi ne, %43, %c0_i32_21 : i32
    scf.if %44 {
      %c0_22 = arith.constant 0 : index
      %c0_23 = arith.constant 0 : index
      %45 = vector.load %arg8[%c0_22, %c0_23] : memref<16x1xf32, #tpu.memory_space<vmem>>, vector<16x1xf32>
      %cst_24 = arith.constant 1.000000e+00 : f32
      %46 = vector.broadcast %cst_24 : f32 to vector<16x1xf32>
      %47 = arith.maximumf %45, %46 : vector<16x1xf32>
      %cst_25 = arith.constant 1.000000e+00 : f32
      %48 = vector.broadcast %cst_25 : f32 to vector<16x1xf32>
      %49 = arith.divf %48, %47 : vector<16x1xf32>
      %c0_26 = arith.constant 0 : index
      %c0_27 = arith.constant 0 : index
      %50 = vector.load %arg6[%c0_26, %c0_27] : memref<16x128xf32, #tpu.memory_space<vmem>>, vector<16x128xf32>
      %51 = vector.broadcast %49 : vector<16x1xf32> to vector<16x128xf32>
      %52 = arith.mulf %50, %51 : vector<16x128xf32>
      %c0_28 = arith.constant 0 : index
      %c0_29 = arith.constant 0 : index
      %53 = vector.load %arg4[%c0_28, %c0_29] : memref<16x128xf32, #tpu.memory_space<vmem>>, vector<16x128xf32>
      tpu.vector_store %arg4[%c0_28, %c0_29], %52 {strides = array<i32>} : memref<16x128xf32, #tpu.memory_space<vmem>>, vector<16x128xf32>,
      %c0_30 = arith.constant 0 : index
      %c0_31 = arith.constant 0 : index
      %54 = vector.load %arg7[%c0_30, %c0_31] : memref<16x128xf32, #tpu.memory_space<vmem>>, vector<16x128xf32>
      %55 = vector.broadcast %49 : vector<16x1xf32> to vector<16x128xf32>
      %56 = arith.mulf %54, %55 : vector<16x128xf32>
      %57 = arith.truncf %56 : vector<16x128xf32> to vector<16x128xbf16>
      %c0_32 = arith.constant 0 : index
      %c0_33 = arith.constant 0 : index
      %58 = vector.load %arg5[%c0_32, %c0_33] : memref<16x128xbf16, #tpu.memory_space<vmem>>, vector<16x128xbf16>
      tpu.vector_store %arg5[%c0_32, %c0_33], %57 {strides = array<i32>} : memref<16x128xbf16, #tpu.memory_space<vmem>>, vector<16x128xbf16>,
    } else {
    }
    return
  }
  func.func @transform_0(%arg0: i32) -> (i32, i32) {
    %c0_i32 = arith.constant 0 : i32
    %c0_i32_0 = arith.constant 0 : i32
    %c0_i32_1 = arith.constant 0 : i32
    return %c0_i32, %c0_i32_0 : i32, i32
  }
  func.func @transform_1(%arg0: i32) -> (i32, i32) {
    %c0_i32 = arith.constant 0 : i32
    %c0_i32_0 = arith.constant 0 : i32
    return %arg0, %c0_i32 : i32, i32
  }
  func.func @transform_2(%arg0: i32) -> (i32, i32) {
    %c0_i32 = arith.constant 0 : i32
    %c0_i32_0 = arith.constant 0 : i32
    return %arg0, %c0_i32 : i32, i32
  }
  func.func @transform_3(%arg0: i32) -> (i32, i32) {
    %c0_i32 = arith.constant 0 : i32
    %c0_i32_0 = arith.constant 0 : i32
    %c0_i32_1 = arith.constant 0 : i32
    return %c0_i32, %c0_i32_0 : i32, i32
  }
  func.func @transform_4(%arg0: i32) -> (i32, i32) {
    %c0_i32 = arith.constant 0 : i32
    %c0_i32_0 = arith.constant 0 : i32
    %c0_i32_1 = arith.constant 0 : i32
    return %c0_i32, %c0_i32_0 : i32, i32
  }
}

</mosaic_0001>

<bundles_post_ra>
// kernel: tpu_custom_call.1
= control target key start
LH: loop header
LB: loop body
LE: loop exit
PB: predicated region body
PF: predicated region fallthrough
CT: control target
= control target key end

     0   :  { %10 = vsyncpa [#allocation6], 0  ;;  %s3968_s0 = inlined_call_operand.hbm [shape: s32[3,512], index: 0, kind: input, shape index: {}]   ;;  %s3969_s1 = inlined_call_operand.hbm [shape: f32[1100,128], index: 1, kind: input, shape index: {}]   ;;  %s3970_s2 = inlined_call_operand.hbm [shape: bf16[1100,128], index: 2, kind: input, shape index: {}]   ;;  %s3971_s3 = inlined_call_operand.hbm [shape: f32[16,128], index: 3, kind: output, shape index: {0}]   ;;  %s3972_s4 = inlined_call_operand.hbm [shape: bf16[16,128], index: 4, kind: output, shape index: {1}]  }
   0x1   :  { %11 = vsyncpa [#allocation9], 0 }
   0x2   :  { %13 = vsyncpa [#allocation9 + $0x1], 0 }
   0x3   :  { %14 = vsyncpa [#allocation7], 0 }
   0x4   :  { %15 = vsyncpa [#allocation13], 0  ;;  %s2281_s15 = smov 0   ;;  %s2283_s16 = smov 0  }
   0x5   :  { %s2285_s17 = smov 0   ;;  %s2287_s18 = smov 0  }
   0x6 LB: > { %s2300_s19 = sadd.s32 4294967295, %s2236_s18   ;;  %s2303_s20 = sadd.s32 1, %s2236_s18   ;;  %s2236_s18 = sphi %s2287_s18, %s4347_s18   ;;  %s2232_s17 = sphi %s2285_s17, %s4346_s17   ;;  %s2228_s16 = sphi %s2283_s16, %s4345_s16   ;;  %s2224_s15 = sphi %s2281_s15, %s4344_s15  }
   0x7   : > { %s46_s21 = ssub.s32 %s2236_s18, %s2303_s20  ;;  %s49_s22 = sadd.s32 1, %s2232_s17 }
   0x8   : > { %p47_p0 = scmp.eq.s32.totalorder %s46_s21, 0  ;;  %p56_p1 = scmp.ne.s32.totalorder %s2232_s17, %s2228_s16 }
   0x9   : > { %p57_p2 = scmp.eq.s32.totalorder %s2236_s18, 0  ;;  %p62_p3 = scmp.ne.s32.totalorder %s2228_s16, %s2224_s15 }
   0xa   : > { %s2313_s23 = scalar_select %p47_p0, %s2232_s17, %s49_s22  }
   0xb   : > { %p2315_p4 = por %p57_p2, %p56_p1  ;;  %p3973_p5 = scmp.eq.s32.totalorder %s2300_s19, 0 }
   0xc   : > { %p1597_p6 = scmp.ge.s32.totalorder %s2236_s18, 1  ;;  %p141_p7 = scmp.lt.s32.totalorder %s2236_s18, 4 }
   0xd   : > { %s4053_s24 = scalar_select %p2315_p4, 1, 0 }
   0xe   : > { %p2324_p8 = por %p3973_p5, %p62_p3  ;;  %p2329_p10 = pnand %p1597_p6, %p141_p7 }
   0xf   : > { %s2238_s27 = smov [#allocation5]   ;;  %s2054_s6 = scalar_lea.hbm %s3968_s0, 256 }
  0x10   : > { %s4054_s25 = scalar_select %p2324_p8, 1, 0 }
  0x11   : > { %s4055_s26 = scalar_select %p2329_p10, 1, 0 }
  0x12   : > { %s154_s28 = sshll.u32 %s2238_s27, 4  ;;  %p1991_p11 = pneg %p2329_p10  ;;  %s155_s28 = int_to_ptr.vmem [resolvable:$true] %s154_s28 }
  0x13   : > { %p2055_p13 = scmp.ne.s32.totalorder %s3968_s0, %s2054_s6  ;;  %p2061_p3 = scmp.lt.u32.totalorder %s2054_s6, %s3968_s0 }
  0x14   : > { %p2337_p12 = pnand %p1991_p11, %p3973_p5 }
  0x16   : > { %p2056_p0 = pneg %p2337_p12 }
  0x18   : > { %p2057_p1 = pnand %p2056_p0, %p2055_p13 }
  0x1a   : > { %p2058_p2 = pneg %p2057_p1 }
  0x1c   : > { %p2063_p6 = pnand %p2061_p3, %p2058_p2 }
  0x1e   : > { %2066 = shalt.err (!%p2063_p6)
}
  0x1f   : > { %s2067_s11 = scalar_lea.vmem %s155_s28, 256  ;;  %p2075_p5 = scmp.lt.s32.totalorder %s155_s28, %s155_s28 }
  0x20   : > { %p2068_p7 = scmp.ne.s32.totalorder %s155_s28, %s2067_s11  ;;  %p2076_p8 = scmp.lt.s32.totalorder %s2067_s11, %s2067_s11 }
  0x22   : > { %p2070_p11 = pnand %p2068_p7, %p2056_p0  ;;  %p2077_p10 = por %p2076_p8, %p2075_p5 }
  0x24   : > { %p2071_p9 = pneg %p2070_p11 }
  0x26   : > { %p2078_p4 = pnand %p2077_p10, %p2071_p9 }
  0x28   : > { %2081 = shalt.err (!%p2078_p4)
}
  0x29   : > { %1994 = dma.hbm_to_vmem [thread:$0]  (!%p2337_p12), %s3968_s0, 256, %s155_s28, [#allocation6]  }
  0x2a   : > { %p1599_p13 = scmp.ge.s32.totalorder %s2236_s18, 3 }
  0x2b   : > { %p4057_p1 = scmp.ne.s32.totalorder (!%p1599_p13), %s4053_s24, 0 }
  0x2c   : > { %161 = sbr.rel (%p1599_p13) target bundleno = 123 (0x7b), region = 20 }
  0x33   : > { %164 = sbr.rel (!%p4057_p1) target bundleno = 86 (0x56), region = 24  ;;  %s165_s14 = sand.u32 (%p4057_p1), 1, %s2236_s18  }
  0x34   : > { %s167_s15 = sand.u32 (%p4057_p1), 1, %s2232_s17   ;;  %s1601_s22 = sshll.u32 (%p4057_p1), %s2236_s18, 6 }
  0x35   : > { %s1600_s21 = sshll.u32 (%p4057_p1), %s167_s15, 9  ;;  %s171_s27 = ssub.s32 (%p4057_p1), 138, %s1601_s22 }
  0x36   : > { %p172_p4 = scmp.lt.s32.totalorder (%p4057_p1), %s171_s27, 64  ;;  %s2366_s30 = scalar_lea.sflag (%p4057_p1), [#allocation9], %s165_s14 }
  0x37   : > { %s169_s5 = scalar_lea.vmem (%p4057_p1), [#allocation8], %s1600_s21 }
  0x3a   : > { %s4349_s27 = smov (!%p172_p4, %s171_s27), 64 }
  0x3b   : > { %s2363_s29 = sshll.u32 %s4349_s27, 7 }
  0x3c   : > { %s176_s28 = ssub.s32 8192, %s2363_s29 }
  0x3d   : > { %177 = vsyncadd %s2366_s30, %s176_s28  ;;  %p1603_p5 = scmp.ne.s32.totalorder %s2363_s29, 0  ;;  %s1751_s6 = sshll.u32 %s2236_s18, 13 }
  0x3e   : > { %s2374_s9 = scalar_lea.hbm %s3969_s1, %s1751_s6  ;;  %s182_s10 = sshll.u32 %s169_s5, 4  ;;  %s2376_s10 = int_to_ptr.vmem [resolvable:$true] %s182_s10 }
  0x3f   : > { %s2082_s11 = scalar_lea.hbm %s2374_s9, %s2363_s29  ;;  %s2086_s14 = scalar_lea.hbm %s3969_s1, 17664 }
  0x40   : > { %p2083_p8 = scmp.ne.s32.totalorder %s2374_s9, %s2082_s11  ;;  %p2087_p12 = scmp.lt.u32.totalorder %s2374_s9, %s3969_s1 }
  0x41   : > { %p2088_p0 = scmp.lt.u32.totalorder %s2086_s14, %s2082_s11  ;;  %p2090_p3 = scmp.lt.u32.totalorder %s2082_s11, %s2374_s9 }
  0x42   : > { %p2084_p9 = pnand %p2083_p8, %p1603_p5 }
  0x43   : > { %p2089_p2 = por %p2088_p0, %p2087_p12 }
  0x44   : > { %p2085_p10 = pneg %p2084_p9 }
  0x45   : > { %p2091_p6 = por %p2090_p3, %p2089_p2 }
  0x47   : > { %p2092_p7 = pnand %p2091_p6, %p2085_p10 }
  0x49   : > { %2095 = shalt.err (!%p2092_p7)
}
  0x4a   : > { %s2096_s22 = scalar_lea.vmem %s2376_s10, %s2363_s29  ;;  %s2239_s27 = smov [#allocation8]  }
  0x4b   : > { %p2097_p11 = scmp.ne.s32.totalorder %s2376_s10, %s2096_s22  ;;  %s2100_s28 = sshll.u32 %s2239_s27, 4  ;;  %s2101_s28 = int_to_ptr.vmem [resolvable:$false] %s2100_s28 }
  0x4c   : > { %s2102_s5 = scalar_lea.vmem %s2101_s28, 16384  ;;  %p2103_p4 = scmp.lt.s32.totalorder %s2376_s10, %s2101_s28 }
  0x4d   : > { %p2098_p13 = pnand %p2097_p11, %p1603_p5  ;;  %p2104_p8 = scmp.lt.s32.totalorder %s2102_s5, %s2096_s22 }
  0x4f   : > { %p2099_p1 = pneg %p2098_p13  ;;  %p2105_p9 = por %p2104_p8, %p2103_p4 }
  0x51   : > { %p2106_p12 = pnand %p2105_p9, %p2099_p1 }
  0x53   : > { %2109 = shalt.err (!%p2106_p12)
}
  0x54   : > { %s2240_s6 = smov 128   ;;  %s2241_s7 = smov 8  }
  0x55   : > { %188 = dma.hbm_to_vmem [thread:$0]  (%p1603_p5), %s2374_s9, %s2363_s29, %s2376_s10, %s2366_s30, %s2240_s6, %s2240_s6, %s2241_s7  }
  0x56 PF: > { %p4058_p10 = scmp.ne.s32.totalorder %s4053_s24, 0 }
  0x57   : > { %s192_s8 = sand.u32 (%p4058_p10), 1, %s2236_s18   ;;  %s194_s11 = sand.u32 (%p4058_p10), 1, %s2232_s17  }
  0x58   : > { %191 = sbr.rel (!%p4058_p10) target bundleno = 123 (0x7b), region = 28  ;;  %s1607_s12 = sshll.u32 (%p4058_p10), %s194_s11, 8 }
  0x59   : > { %s1608_s13 = sshll.u32 (%p4058_p10), %s2236_s18, 6  ;;  %s2411_s22 = scalar_lea.sflag (%p4058_p10), [#allocation9], %s192_s8 }
  0x5a   : > { %s198_s14 = ssub.s32 (%p4058_p10), 138, %s1608_s13  ;;  %s196_s29 = scalar_lea.vmem (%p4058_p10), [#allocation10], %s1607_s12 }
  0x5b   : > { %p199_p0 = scmp.lt.s32.totalorder (%p4058_p10), %s198_s14, 64 }
  0x5f   : > { %s4351_s14 = smov (!%p199_p0, %s198_s14), 64 }
  0x60   : > { %s2408_s15 = sshll.u32 %s4351_s14, 6 }
  0x61   : > { %s203_s21 = ssub.s32 4096, %s2408_s15 }
  0x62   : > { %204 = vsyncadd %s2411_s22, %s203_s21  ;;  %p1610_p5 = scmp.ne.s32.totalorder %s2408_s15, 0  ;;  %s1752_s24 = sshll.u32 %s2236_s18, 12 }
  0x63   : > { %s2419_s10 = scalar_lea.hbm %s3970_s2, %s1752_s24  ;;  %s209_s27 = sshll.u32 %s196_s29, 4  ;;  %s2421_s27 = int_to_ptr.vmem [resolvable:$true] %s209_s27 }
  0x64   : > { %s2110_s28 = scalar_lea.hbm %s2419_s10, %s2408_s15  ;;  %s2114_s18 = scalar_lea.hbm %s3970_s2, 8832 }
  0x65   : > { %p2111_p2 = scmp.ne.s32.totalorder %s2419_s10, %s2110_s28  ;;  %p2115_p7 = scmp.lt.u32.totalorder %s2419_s10, %s3970_s2 }
  0x66   : > { %p2116_p11 = scmp.lt.u32.totalorder %s2114_s18, %s2110_s28  ;;  %p2118_p1 = scmp.lt.u32.totalorder %s2110_s28, %s2419_s10 }
  0x67   : > { %p2112_p3 = pnand %p2111_p2, %p1610_p5 }
  0x68   : > { %p2117_p13 = por %p2116_p11, %p2115_p7 }
  0x69   : > { %p2113_p6 = pneg %p2112_p3 }
  0x6a   : > { %p2119_p4 = por %p2118_p1, %p2117_p13 }
  0x6c   : > { %p2120_p8 = pnand %p2119_p4, %p2113_p6 }
  0x6e   : > { %2123 = shalt.err (!%p2120_p8)
}
  0x6f   : > { %s2124_s11 = scalar_lea.vmem %s2421_s27, %s2408_s15  ;;  %s2242_s12 = smov [#allocation10]  }
  0x70   : > { %p2125_p9 = scmp.ne.s32.totalorder %s2421_s27, %s2124_s11  ;;  %s2128_s13 = sshll.u32 %s2242_s12, 4  ;;  %s2129_s13 = int_to_ptr.vmem [resolvable:$false] %s2128_s13 }
  0x71   : > { %s2130_s14 = scalar_lea.vmem %s2129_s13, 8192  ;;  %p2131_p0 = scmp.lt.s32.totalorder %s2421_s27, %s2129_s13 }
  0x72   : > { %p2126_p12 = pnand %p2125_p9, %p1610_p5  ;;  %p2132_p2 = scmp.lt.s32.totalorder %s2130_s14, %s2124_s11 }
  0x74   : > { %p2127_p10 = pneg %p2126_p12  ;;  %p2133_p3 = por %p2132_p2, %p2131_p0 }
  0x76   : > { %p2134_p7 = pnand %p2133_p3, %p2127_p10 }
  0x78   : > { %2137 = shalt.err (!%p2134_p7)
}
  0x79   : > { %s2243_s21 = smov 64   ;;  %s2244_s29 = smov 4  }
  0x7a   : > { %215 = dma.hbm_to_vmem [thread:$0]  (%p1610_p5), %s2419_s10, %s2408_s15, %s2421_s27, %s2411_s22, %s2243_s21, %s2243_s21, %s2244_s29  }
  0x7b PF: > { %p4059_p6 = scmp.ne.s32.totalorder %s4055_s26, 0 }
  0x7d   : > { %221 = sbr.rel (%p4059_p6) target bundleno = 588 (0x24c), region = 32 }
  0x84   : > { %p4060_p11 = scmp.eq.s32.totalorder %s2300_s19, 0 }
  0x86   : > { %2207 = dma.done.wait (%p4060_p11), [#allocation6], 256   ;;  %p4061_p13 = pmov %p4060_p11 }
  0x87   : > { %s227_s24 = sand.u32 1, %s2300_s19   ;;  %s229_s30 = sand.u32 1, %s2228_s16  }
  0x88   : > { %2209 = vsyncadd (%p4061_p13), [#allocation6], 4294967040  ;;  %s1616_s9 = sshll.u32 %s229_s30, 9  ;;  %s228_s28 = scalar_lea.sflag [#allocation9], %s227_s24 }
  0x89   : > { %s2456_s5 = scalar_lea.vmem [#allocation8], %s1616_s9  ;;  %p4062_p5 = scmp.ne.s32.totalorder %s4054_s25, 0 }
  0x8b   : > { %2211 = dma.done.wait (%p4062_p5), %s228_s28, 12288  }
  0x8c   : > { %2213 = vsyncadd (%p4062_p5), %s228_s28, 4294955008  ;;  %s1617_s26 = sshll.u32 %s229_s30, 8  ;;  %p4063_p1 = scmp.ne.s32.totalorder %s2300_s19, 0 }
  0x8d   : > { %s2462_s15 = scalar_lea.vmem [#allocation10], %s1617_s26  ;;  %vm284_vm0 = vcmask (!%p4063_p1), 7168   ;;  %v2245_v0 = vmov (!%p4063_p1), 0.0  }
  0x8e   : > { %279 = sbr.rel (%p4063_p1) target bundleno = 149 (0x95), region = 48  ;;  %280 = vst [vmem:[#allocation2] sm:$0xff] (!%p4063_p1), %v2245_v0  ;;  %281 = vst [vmem:[#allocation2 + $0x8] sm:$0xff] (!%p4063_p1), %v2245_v0 }
  0x8f   : > { %282 = vst [vmem:[#allocation3] sm:$0xff] (!%p4063_p1), %v2245_v0  ;;  %283 = vst [vmem:[#allocation3 + $0x8] sm:$0xff] (!%p4063_p1), %v2245_v0 }
  0x90   : > { %285 = vst.msk [vmem:[#allocation4] sm:$0xff] (!%p4063_p1), %vm284_vm0, %v2245_v0  ;;  %286 = vst.msk [vmem:[#allocation4 + $0x8] sm:$0xff] (!%p4063_p1), %vm284_vm0, %v2245_v0 }
  0x95 PF: > { %v296_v1 = vlaneseq  ;;  %s1629_s25 = sshll.u32 %s2300_s19, 9  ;;  %v568_v4 = vld [vmem:[%s2456_s5 + $0x80] sm:$0xff]  ;;  %v569_v5 = vld [vmem:[%s2456_s5 + $0x88] sm:$0xff]  ;;  %v570_v40 = vld [vmem:[%s2456_s5 + $0x90] sm:$0xff]  ;;  %s287_s22 = sshra.s32 %s2300_s19, 2 }
  0x96   : > { %v2469_v3 = vstv %s1629_s25  ;;  %v1881_v10 = vpack.c.bf16 %v569_v5, %v568_v4  ;;  %v600_v18 = vld [vmem:[%s2456_s5 + $0x180] sm:$0xff]  ;;  %v601_v19 = vld [vmem:[%s2456_s5 + $0x188] sm:$0xff]  ;;  %v571_v41 = vld [vmem:[%s2456_s5 + $0x98] sm:$0xff]  ;;  %s290_s10 = sand.u32 3, %s2300_s19  ;;  %s1753_s27 = sshll.u32 %s287_s22, 4 }
  0x97   : > { %v2467_v2 = vshrl.u32 %v296_v1, 7  ;;  %v1929_v22 = vpack.c.bf16 %v601_v19, %v600_v18  ;;  %v552_v23 = vld [vmem:[%s2456_s5] sm:$0xff]  ;;  %v553_v24 = vld [vmem:[%s2456_s5 + $0x8] sm:$0xff]  ;;  %v1887_v50 = vpack.c.bf16 %v571_v41, %v570_v40  ;;  %v602_v51 = vld [vmem:[%s2456_s5 + $0x190] sm:$0xff]  ;;  %s2937_s6 = sadd.s32 %s1753_s27, %s290_s10  ;;  %p1742_p4 = scmp.ne.s32.totalorder %s2300_s19, 2 }
  0x98   : > { %v584_v30 = vld [vmem:[%s2456_s5 + $0x100] sm:$0xff]  ;;  %v585_v31 = vld [vmem:[%s2456_s5 + $0x108] sm:$0xff]  ;;  %v1884_v32 = vpack.c.bf16 %v553_v24, %v552_v23  ;;  %v603_v52 = vld [vmem:[%s2456_s5 + $0x198] sm:$0xff]  ;;  %s294_s18 = scalar_lea.vmem [#allocation5], %s2937_s6 }
  0x99   : > { %v375_v6 = vadd.s32 128, %v2467_v2  ;;  %v376_v7 = vadd.s32 136, %v2467_v2  ;;  %v407_v8 = vadd.s32 384, %v2467_v2  ;;  %v408_v9 = vadd.s32 392, %v2467_v2  ;;  %v964_v33 = vld [vmem:[%s2462_s15] sm:$0xf] }
  0x9a   : > { %v2478_v11 = vadd.s32 8, %v2467_v2  ;;  %v424_v12 = vadd.s32 %v2469_v3, %v2467_v2  ;;  %v391_v13 = vadd.s32 256, %v2467_v2  ;;  %v392_v20 = vadd.s32 264, %v2467_v2  ;;  %v965_v38 = vld [vmem:[%s2462_s15 + $0x4] sm:$0xf]  ;;  %v554_v61 = vld [vmem:[%s2456_s5 + $0x10] sm:$0xff] }
  0x9b   : > { %v2484_v14 = vadd.s32 %v2469_v3, %v375_v6  ;;  %v2487_v15 = vadd.s32 %v2469_v3, %v376_v7  ;;  %v2490_v16 = vadd.s32 %v2469_v3, %v407_v8  ;;  %v2493_v17 = vadd.s32 %v2469_v3, %v408_v9  ;;  %v996_v45 = vld [vmem:[%s2462_s15 + $0x80] sm:$0xf]  ;;  %v997_v46 = vld [vmem:[%s2462_s15 + $0x84] sm:$0xf]  ;;  %v555_v62 = vld [vmem:[%s2456_s5 + $0x18] sm:$0xff] }
  0x9c   : > { %4064 = vst [vmem:[#allocation18_spill] sm:$0xff] %v2478_v11  ;;  %v425_v21 = vadd.s32 %v2469_v3, %v2478_v11  ;;  %vm488_vm6 = vcmp.lt.s32.totalorder %v424_v12, 1100  ;;  %v456_v25 = vadd.s32 %v2469_v3, %v391_v13  ;;  %v457_v26 = vadd.s32 %v2469_v3, %v392_v20  ;;  %v586_v7 = vld [vmem:[%s2456_s5 + $0x110] sm:$0xff]  ;;  %v587_v8 = vld [vmem:[%s2456_s5 + $0x118] sm:$0xff]  ;;  %v572_v19 = vld [vmem:[%s2456_s5 + $0xa0] sm:$0xff] }
  0x9d   : > { %vm504_vm1 = vcmp.lt.s32.totalorder %v2484_v14, 1100  ;;  %vm505_vm2 = vcmp.lt.s32.totalorder %v2487_v15, 1100  ;;  %vm536_vm4 = vcmp.lt.s32.totalorder %v2490_v16, 1100  ;;  %vm537_vm5 = vcmp.lt.s32.totalorder %v2493_v17, 1100  ;;  %vm2516_vm7 = vmpackc.low %vm488_vm6, %vm488_vm6  ;;  %v573_v20 = vld [vmem:[%s2456_s5 + $0xa8] sm:$0xff] }
  0x9e   : > { %vm1882_vm3 = vmpackc.low %vm505_vm2, %vm504_vm1  ;;  %v377_v27 = vadd.s32 144, %v2467_v2  ;;  %v378_v28 = vadd.s32 152, %v2467_v2  ;;  %vm489_vm9 = vcmp.lt.s32.totalorder %v425_v21, 1100  ;;  %v409_v34 = vadd.s32 400, %v2467_v2  ;;  %v985_v16 = vld [vmem:[%s2462_s15 + $0x54] sm:$0xf] }
  0x9f   : > { %1883 = vmatprep.subr.msk.bf16.mxu0 %vm1882_vm3, %v1881_v10  ;;  %vm1930_vm8 = vmpackc.low %vm537_vm5, %vm536_vm4  ;;  %v410_v35 = vadd.s32 408, %v2467_v2  ;;  %vm520_vm10 = vcmp.lt.s32.totalorder %v456_v25, 1100  ;;  %vm521_vm11 = vcmp.lt.s32.totalorder %v457_v26, 1100  ;;  %v1932_v39 = vpack.c.bf16 %v585_v31, %v584_v30  ;;  %v604_v26 = vld [vmem:[%s2456_s5 + $0x1a0] sm:$0xff] }
  0xa0   : > { %1931 = vmatprep.subr.msk.bf16.mxu1 %vm1930_vm8, %v1929_v22  ;;  %v2530_v36 = vadd.s32 %v2469_v3, %v377_v27  ;;  %v2533_v37 = vadd.s32 %v2469_v3, %v378_v28  ;;  %vm1885_vm12 = vmpackc.low %vm489_vm9, %vm488_vm6  ;;  %v1092_v42 = vsel %vm2516_vm7, %v964_v33, 0  ;;  %v361_v43 = vadd.s32 16, %v2467_v2  ;;  %v605_v27 = vld [vmem:[%s2456_s5 + $0x1a8] sm:$0xff]  ;;  %v556_v33 = vld [vmem:[%s2456_s5 + $0x20] sm:$0xff] }
  0xa1   : > { %v362_v44 = vadd.s32 24, %v2467_v2  ;;  %1886 = vmatpush3.bf16.msk.msra.mxu0 %vm1885_vm12, %v1884_v32  ;;  %vm1029_vm13 = vmpackc.low %vm489_vm9, %vm489_vm9  ;;  %v2549_v47 = vadd.s32 %v2469_v3, %v409_v34  ;;  %v2552_v48 = vadd.s32 %v2469_v3, %v410_v35  ;;  %v393_v54 = vadd.s32 272, %v2467_v2  ;;  %v557_v34 = vld [vmem:[%s2456_s5 + $0x28] sm:$0xff] }
  0xa2   : > { %v1093_v49 = vsel %vm1029_vm13, %v965_v38, 0  ;;  %vm1933_vm14 = vmpackc.low %vm521_vm11, %vm520_vm10  ;;  %vm3983_vm15 = vcmp.lt.s32.totalorder %v2530_v36, 1100  ;;  %vm3982_vm0 = vcmp.lt.s32.totalorder %v2533_v37, 1100  ;;  %v394_v55 = vadd.s32 280, %v2467_v2 }
  0xa3   : > { %v2560_v53 = vcombine.low %v1092_v42, %v1093_v49  ;;  %1934 = vmatpush3.bf16.msk.msra.mxu1 %vm1933_vm14, %v1932_v39  ;;  %vm1060_vm3 = vmpackc.low %vm520_vm10, %vm520_vm10  ;;  %v2569_v57 = vadd.s32 %v2469_v3, %v361_v43  ;;  %v2572_v58 = vadd.s32 %v2469_v3, %v362_v44  ;;  %vm3981_vm8 = vcmp.lt.s32.totalorder %v2549_v47, 1100  ;;  %v588_v42 = vld [vmem:[%s2456_s5 + $0x120] sm:$0xff]  ;;  %v589_v43 = vld [vmem:[%s2456_s5 + $0x128] sm:$0xff] }
  0xa4   : > { %vm1061_vm6 = vmpackc.low %vm521_vm11, %vm521_vm11  ;;  %v1124_v56 = vsel %vm1060_vm3, %v996_v45, 0  ;;  %vm3976_vm9 = vcmp.lt.s32.totalorder %v2552_v48, 1100  ;;  %v1935_v60 = vpack.c.bf16 %v603_v52, %v602_v51  ;;  %v379_v0 = vadd.s32 160, %v2467_v2  ;;  %v574_v51 = vld [vmem:[%s2456_s5 + $0xb0] sm:$0xff]  ;;  %v575_v52 = vld [vmem:[%s2456_s5 + $0xb8] sm:$0xff] }
  0xa5   : > { %4067 = vst [vmem:[#allocation19_spill] sm:$0xff] %v2560_v53  ;;  %v1125_v59 = vsel %vm1061_vm6, %v997_v46, 0  ;;  %vm1888_vm7 = vmpackc.low %vm3982_vm0, %vm3983_vm15  ;;  %v380_v1 = vadd.s32 168, %v2467_v2  ;;  %v2587_v4 = vadd.s32 %v2469_v3, %v393_v54  ;;  %v2590_v5 = vadd.s32 %v2469_v3, %v394_v55  ;;  %v2940_v53 = vld [vmem:[%s2462_s15 + $0x90] sm:$0xf] }
  0xa6   : > { %v2582_v63 = vcombine.low %v1124_v56, %v1125_v59  ;;  %1889 = vmatprep.subr.msk.bf16.mxu0 %vm1888_vm7, %v1887_v50  ;;  %vm1936_vm10 = vmpackc.low %vm3976_vm9, %vm3981_vm8  ;;  %vm490_vm11 = vcmp.lt.s32.totalorder %v2569_v57, 1100  ;;  %vm491_vm12 = vcmp.lt.s32.totalorder %v2572_v58, 1100  ;;  %v1890_v6 = vpack.c.bf16 %v555_v62, %v554_v61  ;;  %v606_v61 = vld [vmem:[%s2456_s5 + $0x1b0] sm:$0xff]  ;;  %v607_v62 = vld [vmem:[%s2456_s5 + $0x1b8] sm:$0xff]  ;;  %4100 = vst [vmem:[#allocation32_spill] sm:$0xff] %v2940_v53 }
  0xa7   : > { %1937 = vmatprep.subr.msk.bf16.mxu1 %vm1936_vm10, %v1935_v60  ;;  %v411_v9 = vadd.s32 416, %v2467_v2  ;;  %v412_v10 = vadd.s32 424, %v2467_v2  ;;  %v2603_v12 = vadd.s32 %v2469_v3, %v379_v0  ;;  %v2606_v13 = vadd.s32 %v2469_v3, %v380_v1  ;;  %vm1891_vm13 = vmpackc.low %vm491_vm12, %vm490_vm11  ;;  %v984_v59 = vld [vmem:[%s2462_s15 + $0x50] sm:$0xf] }
  0xa8   : > { %4068 = vst [vmem:[#allocation20_spill] sm:$0xff] %v2582_v63  ;;  %vm522_vm14 = vcmp.lt.s32.totalorder %v2587_v4, 1100  ;;  %vm523_vm3 = vcmp.lt.s32.totalorder %v2590_v5, 1100  ;;  %v1938_v18 = vpack.c.bf16 %v587_v8, %v586_v7  ;;  %1892 = vmatpush3.bf16.msk.msra.mxu0 %vm1891_vm13, %v1890_v6  ;;  %v363_v21 = vadd.s32 32, %v2467_v2  ;;  %vm2683_vm8 = vmpackc.low %vm504_vm1, %vm504_vm1  ;;  %v2720_v7 = vld [vmem:[%s2462_s15 + $0x40] sm:$0xf] }
  0xa9   : > { %v364_v22 = vadd.s32 40, %v2467_v2  ;;  %v2619_v23 = vadd.s32 %v2469_v3, %v411_v9  ;;  %v2622_v24 = vadd.s32 %v2469_v3, %v412_v10  ;;  %vm1939_vm6 = vmpackc.low %vm523_vm3, %vm522_vm14  ;;  %vm3978_vm7 = vcmp.lt.s32.totalorder %v2603_v12, 1100  ;;  %v2723_v8 = vld [vmem:[%s2462_s15 + $0x44] sm:$0xf] }
  0xaa   : > { %vm3977_vm10 = vcmp.lt.s32.totalorder %v2606_v13, 1100  ;;  %v1893_v25 = vpack.c.bf16 %v573_v20, %v572_v19  ;;  %1940 = vmatpush3.bf16.msk.msra.mxu1 %vm1939_vm6, %v1938_v18  ;;  %v395_v28 = vadd.s32 288, %v2467_v2  ;;  %v396_v29 = vadd.s32 296, %v2467_v2  ;;  %vm2692_vm0 = vmpackc.low %vm505_vm2, %vm505_vm2  ;;  %v558_v18 = vld [vmem:[%s2456_s5 + $0x30] sm:$0xff]  ;;  %v559_v19 = vld [vmem:[%s2456_s5 + $0x38] sm:$0xff] }
  0xab   : > { %v2635_v30 = vadd.s32 %v2469_v3, %v363_v21  ;;  %v2638_v31 = vadd.s32 %v2469_v3, %v364_v22  ;;  %vm1894_vm13 = vmpackc.low %vm3977_vm10, %vm3978_vm7  ;;  %vm3980_vm9 = vcmp.lt.s32.totalorder %v2619_v23, 1100  ;;  %vm3979_vm6 = vcmp.lt.s32.totalorder %v2622_v24, 1100  ;;  %v2747_v20 = vld [vmem:[%s2462_s15 + $0xc0] sm:$0xf]  ;;  %v2750_v21 = vld [vmem:[%s2462_s15 + $0xc4] sm:$0xf] }
  0xac   : > { %v1941_v32 = vpack.c.bf16 %v605_v27, %v604_v26  ;;  %1895 = vmatprep.subr.msk.bf16.mxu0 %vm1894_vm13, %v1893_v25  ;;  %v381_v35 = vadd.s32 176, %v2467_v2  ;;  %v382_v38 = vadd.s32 184, %v2467_v2  ;;  %v2651_v39 = vadd.s32 %v2469_v3, %v395_v28  ;;  %vm1942_vm10 = vmpackc.low %vm3979_vm6, %vm3980_vm9  ;;  %v2762_v27 = vld [vmem:[%s2462_s15 + $0x8] sm:$0xf]  ;;  %v2765_v28 = vld [vmem:[%s2462_s15 + $0xc] sm:$0xf] }
  0xad   : > { %v2654_v40 = vadd.s32 %v2469_v3, %v396_v29  ;;  %vm492_vm7 = vcmp.lt.s32.totalorder %v2635_v30, 1100  ;;  %vm493_vm13 = vcmp.lt.s32.totalorder %v2638_v31, 1100  ;;  %v1896_v41 = vpack.c.bf16 %v557_v34, %v556_v33  ;;  %vm2713_vm2 = vmpackc.low %vm536_vm4, %vm536_vm4  ;;  %v2781_v33 = vld [vmem:[%s2462_s15 + $0x88] sm:$0xf]  ;;  %v590_v34 = vld [vmem:[%s2456_s5 + $0x130] sm:$0xff] }
  0xae   : > { %1943 = vmatprep.subr.msk.bf16.mxu1 %vm1942_vm10, %v1941_v32  ;;  %v413_v44 = vadd.s32 432, %v2467_v2  ;;  %v414_v45 = vadd.s32 440, %v2467_v2  ;;  %v2667_v46 = vadd.s32 %v2469_v3, %v381_v35  ;;  %v2670_v49 = vadd.s32 %v2469_v3, %v382_v38  ;;  %vm1897_vm6 = vmpackc.low %vm493_vm13, %vm492_vm7  ;;  %v591_v35 = vld [vmem:[%s2456_s5 + $0x138] sm:$0xff]  ;;  %v2930_v31 = vld [vmem:[%s2456_s5 + $0xd0] sm:$0xff] }
  0xaf   : > { %vm3985_vm9 = vcmp.lt.s32.totalorder %v2651_v39, 1100  ;;  %vm3984_vm10 = vcmp.lt.s32.totalorder %v2654_v40, 1100  ;;  %v1944_v50 = vpack.c.bf16 %v589_v43, %v588_v42  ;;  %1898 = vmatpush3.bf16.msk.msra.mxu0 %vm1897_vm6, %v1896_v41  ;;  %v365_v55 = vadd.s32 48, %v2467_v2  ;;  %v2899_v43 = vld [vmem:[%s2456_s5 + $0x148] sm:$0xff]  ;;  %v2904_v41 = vld [vmem:[%s2462_s15 + $0x14] sm:$0xf] }
  0xb0   : > { %v366_v56 = vadd.s32 56, %v2467_v2  ;;  %v2697_v14 = vadd.s32 %v2469_v3, %v413_v44  ;;  %v2700_v60 = vadd.s32 %v2469_v3, %v414_v45  ;;  %vm1945_vm1 = vmpackc.low %vm3984_vm10, %vm3985_vm9  ;;  %vm3996_vm6 = vcmp.lt.s32.totalorder %v2667_v46, 1100  ;;  %v2802_v44 = vld [vmem:[%s2462_s15 + $0x8c] sm:$0xf] }
  0xb1   : > { %vm3986_vm15 = vcmp.lt.s32.totalorder %v2670_v49, 1100  ;;  %v1899_v15 = vpack.c.bf16 %v575_v52, %v574_v51  ;;  %1946 = vmatpush3.bf16.msk.msra.mxu1 %vm1945_vm1, %v1944_v50  ;;  %v397_v1 = vadd.s32 304, %v2467_v2  ;;  %v398_v6 = vadd.s32 312, %v2467_v2  ;;  %vm2728_vm10 = vmpackc.low %vm537_vm5, %vm537_vm5 }
  0xb2   : > { %v2733_v9 = vadd.s32 %v2469_v3, %v365_v55  ;;  %v2736_v10 = vadd.s32 %v2469_v3, %v366_v56  ;;  %vm1900_vm4 = vmpackc.low %vm3986_vm15, %vm3996_vm6  ;;  %vm3988_vm1 = vcmp.lt.s32.totalorder %v2697_v14, 1100  ;;  %vm3987_vm5 = vcmp.lt.s32.totalorder %v2700_v60, 1100  ;;  %v576_v56 = vld [vmem:[%s2456_s5 + $0xc0] sm:$0xff] }
  0xb3   : > { %v1947_v17 = vpack.c.bf16 %v607_v62, %v606_v61  ;;  %vm2755_vm9 = vmpackc.low %vm490_vm11, %vm490_vm11  ;;  %v4079_v22 = vmov 0  ;;  %1901 = vmatprep.subr.msk.bf16.mxu0 %vm1900_vm4, %v1899_v15  ;;  %v383_v25 = vadd.s32 192, %v2467_v2  ;;  %v384_v26 = vadd.s32 200, %v2467_v2  ;;  %v577_v15 = vld [vmem:[%s2456_s5 + $0xc8] sm:$0xff] }
  0xb4   : > { %4077 = vst [vmem:[#allocation21_spill] sm:$0xff] %v2733_v9  ;;  %4078 = vst [vmem:[#allocation22_spill] sm:$0xff] %v2736_v10  ;;  %v4080_v22 = vsel %vm2755_vm9, 4294967295, %v4079_v22  ;;  %v4081_v57 = vmov 0  ;;  %v2775_v29 = vadd.s32 %v2469_v3, %v397_v1  ;;  %v2778_v32 = vadd.s32 %v2469_v3, %v398_v6  ;;  %v2841_v1 = vld [vmem:[%s2456_s5 + $0x1c0] sm:$0xff] }
  0xb5   : > { %vm2770_vm15 = vmpackc.low %vm491_vm12, %vm491_vm12  ;;  %vm3990_vm4 = vcmp.lt.s32.totalorder %v2733_v9, 1100  ;;  %vm3989_vm12 = vcmp.lt.s32.totalorder %v2736_v10, 1100  ;;  %v1902_v58 = vpack.c.bf16 %v559_v19, %v558_v18  ;;  %v415_v38 = vadd.s32 448, %v2467_v2  ;;  %v2851_v18 = vld [vmem:[%s2456_s5 + $0x1c8] sm:$0xff]  ;;  %v3000_v10 = vld [vmem:[%s2456_s5 + $0x1d8] sm:$0xff] }
  0xb6   : > { %v4082_v57 = vsel %vm2770_vm15, 4294967295, %v4081_v57  ;;  %4083 = vst [vmem:[#allocation23_spill] sm:$0xff] %v2775_v29  ;;  %4084 = vst [vmem:[#allocation24_spill] sm:$0xff] %v2778_v32  ;;  %v4085_v45 = vmov 0  ;;  %v416_v50 = vadd.s32 456, %v2467_v2  ;;  %v4087_v52 = vmov 0 }
  0xb7   : > { %vm1948_vm11 = vmpackc.low %vm3987_vm5, %vm3988_vm1  ;;  %v2823_v4 = vadd.s32 %v2469_v3, %v383_v25  ;;  %v2826_v55 = vadd.s32 %v2469_v3, %v384_v26  ;;  %v367_v61 = vadd.s32 64, %v2467_v2  ;;  %v1950_v62 = vpack.c.bf16 %v591_v35, %v590_v34  ;;  %v2855_v25 = vld [vmem:[%s2456_s5 + $0x40] sm:$0xff]  ;;  %v2858_v26 = vld [vmem:[%s2456_s5 + $0x48] sm:$0xff] }
  0xb8   : > { %vm2807_vm5 = vmpackc.low %vm522_vm14, %vm522_vm14  ;;  %1949 = vmatprep.subr.msk.bf16.mxu1 %vm1948_vm11, %v1947_v17  ;;  %vm3991_vm11 = vcmp.lt.s32.totalorder %v2778_v32, 1100  ;;  %v2848_v17 = vadd.s32 %v2469_v3, %v415_v38  ;;  %v368_v19 = vadd.s32 72, %v2467_v2  ;;  %v399_v34 = vadd.s32 320, %v2467_v2  ;;  %v2879_v35 = vld [vmem:[%s2462_s15 + $0x10] sm:$0xf] }
  0xb9   : > { %v4086_v45 = vsel %vm2807_vm5, 4294967295, %v4085_v45  ;;  %vm2818_vm1 = vmpackc.low %vm523_vm3, %vm523_vm3  ;;  %4089 = vst [vmem:[#allocation25_spill] sm:$0xff] %v2823_v4  ;;  %vm3992_vm3 = vcmp.lt.s32.totalorder %v2775_v29, 1100  ;;  %v4092_v38 = vmov 0  ;;  %v1905_v5 = vpack.c.bf16 %v577_v15, %v576_v56  ;;  %v2943_v15 = vld [vmem:[%s2462_s15 + $0x94] sm:$0xf] }
  0xba   : > { %v4088_v52 = vsel %vm2818_vm1, 4294967295, %v4087_v52  ;;  %4090 = vst [vmem:[#allocation26_spill] sm:$0xff] %v2826_v55  ;;  %vm1903_vm14 = vmpackc.low %vm3989_vm12, %vm3990_vm4  ;;  %v2875_v6 = vadd.s32 %v2469_v3, %v416_v50  ;;  %vm3994_vm4 = vcmp.lt.s32.totalorder %v2823_v4, 1100  ;;  %v2888_v30 = vadd.s32 %v2469_v3, %v367_v61 }
  0xbb   : > { %1904 = vmatpush3.bf16.msk.msra.mxu0 %vm1903_vm14, %v1902_v58  ;;  %4091 = vst [vmem:[#allocation27_spill] sm:$0xff] %v2848_v17  ;;  %vm2870_vm14 = vmpackc.low %vm492_vm7, %vm492_vm7  ;;  %vm3993_vm7 = vcmp.lt.s32.totalorder %v2826_v55, 1100  ;;  %v400_v56 = vadd.s32 328, %v2467_v2  ;;  %v1953_v50 = vpack.c.bf16 %v2851_v18, %v2841_v1  ;;  %v2896_v58 = vld [vmem:[%s2456_s5 + $0x140] sm:$0xff]  ;;  %v385_v51 = vadd.s32 208, %v2467_v2 }
  0xbc   : > { %v4093_v38 = vsel %vm2870_vm14, 4294967295, %v4092_v38  ;;  %4094 = vst [vmem:[#allocation28_spill] sm:$0xff] %v2875_v6  ;;  %vm1951_vm12 = vmpackc.low %vm3991_vm11, %vm3992_vm3  ;;  %v386_v61 = vadd.s32 216, %v2467_v2  ;;  %v2915_v1 = vadd.s32 %v2469_v3, %v368_v19  ;;  %v2918_v18 = vadd.s32 %v2469_v3, %v399_v34  ;;  %v2933_v19 = vld [vmem:[%s2456_s5 + $0xd8] sm:$0xff] }
  0xbd   : > { %4095 = vst [vmem:[#allocation29_spill] sm:$0xff] %v2888_v30  ;;  %1952 = vmatpush3.bf16.msk.msra.mxu1 %vm1951_vm12, %v1950_v62  ;;  %vm2909_vm12 = vmpackc.low %vm493_vm13, %vm493_vm13  ;;  %v4096_v62 = vmov 0  ;;  %v417_v42 = vadd.s32 464, %v2467_v2  ;;  %v418_v34 = vadd.s32 472, %v2467_v2  ;;  %v369_v63 = vadd.s32 80, %v2467_v2 }
  0xbe   : > { %v4097_v62 = vsel %vm2909_vm12, 4294967295, %v4096_v62  ;;  %4098 = vst [vmem:[#allocation30_spill] sm:$0xff] %v2915_v1  ;;  %4099 = vst [vmem:[#allocation31_spill] sm:$0xff] %v2918_v18  ;;  %v4102_v32 = vmov 0  ;;  %v2954_v29 = vadd.s32 %v2469_v3, %v400_v56  ;;  %v1956_v55 = vpack.c.bf16 %v2899_v43, %v2896_v58  ;;  %v2997_v56 = vld [vmem:[%s2456_s5 + $0x1d0] sm:$0xff] }
  0xbf   : > { %vm1906_vm13 = vmpackc.low %vm3993_vm7, %vm3994_vm4  ;;  %vm4101_vm7 = vcmp.lt.s32.totalorder %v2651_v39, 1100  ;;  %v370_v4 = vadd.s32 88, %v2467_v2  ;;  %vm4105_vm3 = vcmp.lt.s32.totalorder %v2530_v36, 1100  ;;  %vm4111_vm6 = vcmp.lt.s32.totalorder %v2549_v47, 1100  ;;  %v986_v43 = vld [vmem:[%s2462_s15 + $0x58] sm:$0xf] }
  0xc0   : > { %vm2948_vm4 = vmpackc.low %vm4101_vm7, %vm4101_vm7  ;;  %1907 = vmatprep.subr.msk.bf16.mxu0 %vm1906_vm13, %v1905_v5  ;;  %4104 = vst [vmem:[#allocation33_spill] sm:$0xff] %v2954_v29  ;;  %vm4108_vm7 = vcmp.lt.s32.totalorder %v2533_v37, 1100  ;;  %v4115_v37 = vmov 0  ;;  %v2991_v58 = vadd.s32 %v2469_v3, %v385_v51  ;;  %v2994_v47 = vadd.s32 %v2469_v3, %v386_v61 }
  0xc1   : > { %v4103_v32 = vsel %vm2948_vm4, 4294967295, %v4102_v32  ;;  %vm2962_vm11 = vmpackc.low %vm4105_vm3, %vm4105_vm3  ;;  %vm4114_vm3 = vcmp.lt.s32.totalorder %v2654_v40, 1100  ;;  %v401_v36 = vadd.s32 336, %v2467_v2  ;;  %vm4017_vm12 = vcmp.lt.s32.totalorder %v2915_v1, 1100  ;;  %v3087_v1 = vld [vmem:[%s2456_s5 + $0x150] sm:$0xff] }
  0xc2   : > { %vm2969_vm13 = vmpackc.low %vm4108_vm7, %vm4108_vm7  ;;  %vm4118_vm7 = vcmp.lt.s32.totalorder %v2875_v6, 1100  ;;  %v3012_v51 = vadd.s32 %v2469_v3, %v417_v42  ;;  %vm4119_vm9 = vcmp.lt.s32.totalorder %v2552_v48, 1100  ;;  %v3028_v40 = vadd.s32 %v2469_v3, %v369_v63  ;;  %v3031_v42 = vld [vmem:[%s2456_s5 + $0x50] sm:$0xff]  ;;  %v3034_v48 = vld [vmem:[%s2456_s5 + $0x58] sm:$0xff]  ;;  %4136 = vst [vmem:[#allocation37_spill] sm:$0xff] %v3087_v1 }
  0xc3   : > { %vm2976_vm14 = vmpackc.low %vm4111_vm6, %vm4111_vm6  ;;  %vm4117_vm6 = vcmp.lt.s32.totalorder %v2848_v17, 1100  ;;  %v3025_v17 = vadd.s32 %v2469_v3, %v418_v34  ;;  %4122 = vst [vmem:[#allocation34_spill] sm:$0xff] %v3031_v42  ;;  %v402_v9 = vadd.s32 344, %v2467_v2  ;;  %v3058_v34 = vadd.s32 %v2469_v3, %v370_v4  ;;  %v3071_v63 = vld [vmem:[%s294_s18] ss:$4 sm:$0xf] }
  0xc4   : > { %vm2986_vm5 = vmpackc.low %vm4114_vm3, %vm4114_vm3  ;;  %4123 = vst [vmem:[#allocation35_spill] sm:$0xff] %v3034_v48  ;;  %v387_v6 = vadd.s32 224, %v2467_v2  ;;  %vm4132_vm1 = vcmp.lt.s32.totalorder %v2619_v23, 1100  ;;  %v4133_v4 = vmov 0  ;;  %v388_v23 = vadd.s32 232, %v2467_v2 }
  0xc5   : > { %v4116_v37 = vsel %vm2986_vm5, 4294967295, %v4115_v37  ;;  %vm1954_vm3 = vmpackc.low %vm4118_vm7, %vm4117_vm6  ;;  %vm4127_vm7 = vcmp.lt.s32.totalorder %v2606_v13, 1100  ;;  %4130 = vst [vmem:[#allocation36_spill] sm:$0xff] %v3058_v34  ;;  %v3067_v13 = vadd.s32 %v2469_v3, %v401_v36  ;;  %v305_v53 = vsub.s32 1, %v2467_v2  ;;  %v982_v42 = vld [vmem:[%s2462_s15 + $0x48] sm:$0xf] }
  0xc6   : > { %vm3017_vm15 = vmpackc.low %vm4119_vm9, %vm4119_vm9  ;;  %1955 = vmatprep.subr.msk.bf16.mxu1 %vm1954_vm3, %v1953_v50  ;;  %vm4124_vm9 = vcmp.lt.s32.totalorder %v2603_v12, 1100  ;;  %v4128_v50 = vmov 0  ;;  %v4135_v12 = vpack.c.bf16 %v2858_v26, %v2855_v25  ;;  %v3104_v26 = vadd.s32 %v2469_v3, %v402_v9  ;;  %v983_v48 = vld [vmem:[%s2462_s15 + $0x4c] sm:$0xf] }
  0xc7   : > { %vm3040_vm6 = vmpackc.low %vm4124_vm9, %vm4124_vm9  ;;  %vm4131_vm9 = vcmp.lt.s32.totalorder %v2888_v30, 1100  ;;  %v3090_v30 = vld [vmem:[%s2456_s5 + $0x158] sm:$0xff]  ;;  %vm4142_vm4 = vcmp.lt.s32.totalorder %v2954_v29, 1100  ;;  %v3114_v36 = vrot.slane %v3071_v63, %v305_v53  ;;  %v313_v53 = vsub.s32 3, %v2467_v2 }
  0xc8   : > { %vm3047_vm3 = vmpackc.low %vm4127_vm7, %vm4127_vm7  ;;  %4137 = vst [vmem:[#allocation38_spill] sm:$0xff] %v3090_v30  ;;  %v4152_v1 = vsel %vm2728_vm10, %v2750_v21, 0  ;;  %v2246_v0 = vmov 1.0   ;;  %vm4156_vm10 = vcmp.lt.s32.totalorder %v2697_v14, 1100  ;;  %v564_v21 = vld [vmem:[%s2456_s5 + $0x60] sm:$0xff] }
  0xc9   : > { %v4129_v50 = vsel %vm3047_vm3, 4294967295, %v4128_v50  ;;  %vm1909_vm7 = vmpackc.low %vm4017_vm12, %vm4131_vm9  ;;  %vm4141_vm3 = vcmp.lt.s32.totalorder %v2918_v18, 1100  ;;  %vm4143_vm9 = vcmp.lt.s32.totalorder %v2667_v46, 1100  ;;  %v3128_v18 = vadd.s32 %v2469_v3, %v387_v6 }
  0xca   : > { %vm3076_vm5 = vmpackc.low %vm4132_vm1, %vm4132_vm1  ;;  %1910 = vmatpush3.bf16.msk.msra.mxu0 %vm1909_vm7, %v4135_v12  ;;  %vm4138_vm1 = vcmp.lt.s32.totalorder %v2622_v24, 1100  ;;  %v419_v12 = vadd.s32 480, %v2467_v2  ;;  %v420_v24 = vadd.s32 488, %v2467_v2  ;;  %v4150_v6 = vsel %vm2692_vm0, %v2723_v8, 0 }
  0xcb   : > { %v4134_v4 = vsel %vm3076_vm5, 4294967295, %v4133_v4  ;;  %vm3097_vm12 = vmpackc.low %vm4138_vm1, %vm4138_vm1  ;;  %vm4048_vm1 = vcmp.lt.s32.totalorder %v3058_v34, 1100  ;;  %v1014_v34 = vld [vmem:[%s2462_s15 + $0xc8] sm:$0xf]  ;;  %vm4154_vm0 = vcmp.lt.s32.totalorder %v2991_v58, 1100  ;;  %v3181_v8 = vrot.slane %v3071_v63, %v313_v53 }
  0xcc   : > { %vm1957_vm5 = vmpackc.low %vm4142_vm4, %vm4141_vm3  ;;  %vm4146_vm3 = vcmp.lt.s32.totalorder %v2670_v49, 1100  ;;  %v4151_v49 = vsel %vm2683_vm8, %v2720_v7, 0  ;;  %vm4042_vm4 = vcmp.lt.s32.totalorder %v3104_v26, 1100  ;;  %v3173_v54 = vadd.s32 %v2469_v3, %v419_v12 }
  0xcd   : > { %vm3120_vm7 = vmpackc.low %vm4143_vm9, %vm4143_vm9  ;;  %1958 = vmatpush3.bf16.msk.msra.mxu1 %vm1957_vm5, %v1956_v55  ;;  %v3141_v55 = vadd.s32 %v2469_v3, %v388_v23  ;;  %vm4043_vm5 = vcmp.eq.s32.totalorder %v3114_v36, %v2467_v2  ;;  %v3153_v29 = vcombine.low %v4151_v49, %v4150_v6  ;;  %v4153_v23 = vsel %vm2713_vm2, %v2747_v20, 0  ;;  %v1016_v20 = vld [vmem:[%s2462_s15 + $0xd0] sm:$0xf]  ;;  %v1017_v49 = vld [vmem:[%s2462_s15 + $0xd4] sm:$0xf] }
  0xce   : > { %vm3136_vm9 = vmpackc.low %vm4146_vm3, %vm4146_vm3  ;;  %v3163_v30 = vcombine.low %v4153_v23, %v4152_v1  ;;  %vm4155_vm3 = vcmp.lt.s32.totalorder %v2994_v47, 1100  ;;  %v371_v7 = vadd.s32 96, %v2467_v2  ;;  %1662 = vmatprep.mubr.msk.f32.mxu0 %vm4043_vm5, %v2246_v0  ;;  %v4159_v1 = vpack.c.bf16 %v2933_v19, %v2930_v31 }
  0xcf   : > { %4149 = vst [vmem:[#allocation39_spill] sm:$0xff] %v3141_v55  ;;  %v1015_v55 = vld [vmem:[%s2462_s15 + $0xcc] sm:$0xf]  ;;  %vm1912_vm8 = vmpackc.low %vm4155_vm3, %vm4154_vm0  ;;  %v3196_v12 = vadd.s32 %v2469_v3, %v420_v24  ;;  %v1110_v53 = vsel %vm2962_vm11, %v982_v42, 0  ;;  %v1111_v6 = vsel %vm2969_vm13, %v983_v48, 0  ;;  %v1142_v14 = vsel %vm2976_vm14, %v1014_v34, 0 }
  0xd0   : > { %vm3188_vm2 = vmpackc.low %vm4156_vm10, %vm4156_vm10  ;;  %1913 = vmatprep.subr.msk.bf16.mxu0 %vm1912_vm8, %v4159_v1  ;;  %vm4160_vm0 = vcmp.lt.s32.totalorder %v2700_v60, 1100  ;;  %vm4039_vm8 = vcmp.eq.s32.totalorder %v3181_v8, %v2467_v2  ;;  %v301_v19 = vsub.s32 0, %v2467_v2  ;;  %v3215_v39 = vcombine.low %v1110_v53, %v1111_v6  ;;  %v987_v42 = vld [vmem:[%s2462_s15 + $0x5c] sm:$0xf]  ;;  %v581_v53 = vld [vmem:[%s2456_s5 + $0xe8] sm:$0xff] }
  0xd1   : > { %vm3208_vm3 = vmpackc.low %vm4160_vm0, %vm4160_vm0  ;;  %v1143_v5 = vsel %vm3017_vm15, %v1015_v55, 0  ;;  %vm4163_vm11 = vcmp.lt.s32.totalorder %v3012_v51, 1100  ;;  %vm4164_vm14 = vcmp.lt.s32.totalorder %v3025_v17, 1100  ;;  %1698 = vmatprep.mubr.msk.f32.mxu1 %vm4039_vm8, %v2246_v0  ;;  %v309_v60 = vsub.s32 2, %v2467_v2 }
  0xd2   : > { %vm1960_vm13 = vmpackc.low %vm4164_vm14, %vm4163_vm11  ;;  %v3230_v48 = vcombine.low %v1142_v14, %v1143_v5  ;;  %vm4165_vm15 = vnez %v4082_v57  ;;  %vm4167_vm10 = vnez %v4080_v22  ;;  %vm4169_vm0 = vnez %v4088_v52  ;;  %v1018_v57 = vld [vmem:[%s2462_s15 + $0xd8] sm:$0xf]  ;;  %v580_v52 = vld [vmem:[%s2456_s5 + $0xe0] sm:$0xff] }
  0xd3   : > { %v4166_v61 = vsel %vm4165_vm15, %v2765_v28, 0  ;;  %v4168_v34 = vsel %vm4167_vm10, %v2762_v27, 0  ;;  %v4170_v55 = vsel %vm4169_vm0, %v2802_v44, 0  ;;  %vm4171_vm11 = vnez %v4086_v45  ;;  %v1019_v28 = vld [vmem:[%s2462_s15 + $0xdc] sm:$0xf] }
  0xd4   : > { %v3240_v24 = vcombine.low %v4168_v34, %v4166_v61  ;;  %v4172_v23 = vsel %vm4171_vm11, %v2781_v33, 0  ;;  %v4173_v22 = vpack.c.bf16 %v3000_v10, %v2997_v56  ;;  %v1112_v27 = vsel %vm3040_vm6, %v984_v59, 0 }
  0xd5   : > { %v3250_v1 = vcombine.low %v4172_v23, %v4170_v55  ;;  %vm4174_vm14 = vnez %v4129_v50  ;;  %vm4175_vm15 = vnez %v4134_v4  ;;  %v1145_v33 = vsel %vm3097_vm12, %v1017_v49, 0  ;;  %v4183_v4 = vld [vmem:[#allocation32_spill] sm:$0xff]  ;;  %v596_v23 = vld [vmem:[%s2456_s5 + $0x160] sm:$0xff] }
  0xd6   : > { %1961 = vmatprep.subr.msk.bf16.mxu1 %vm1960_vm13, %v4173_v22  ;;  %v1113_v44 = vsel %vm4174_vm14, %v985_v16, 0  ;;  %v1144_v45 = vsel %vm4175_vm15, %v1016_v20, 0  ;;  %vm4176_vm13 = vnez %v4097_v62  ;;  %vm4178_vm6 = vnez %v4093_v38  ;;  %v612_v38 = vld [vmem:[%s2456_s5 + $0x1e0] sm:$0xff]  ;;  %v4188_v20 = vld [vmem:[#allocation34_spill] sm:$0xff]  ;;  %v4193_v22 = vld [vmem:[#allocation37_spill] sm:$0xff] }
  0xd7   : > { %v3267_v6 = vcombine.low %v1112_v27, %v1113_v44  ;;  %v3269_v14 = vcombine.low %v1144_v45, %v1145_v33  ;;  %v4177_v11 = vsel %vm4176_vm13, %v2904_v41, 0  ;;  %v4179_v10 = vsel %vm4178_vm6, %v2879_v35, 0  ;;  %v4186_v41 = vld [vmem:[#allocation36_spill] sm:$0xff]  ;;  %v4187_v16 = vld [vmem:[#allocation35_spill] sm:$0xff] }
  0xd8   : > { %v3279_v56 = vcombine.low %v4179_v10, %v4177_v11  ;;  %vm4180_vm12 = vnez %v4116_v37  ;;  %vm4182_vm10 = vnez %v4103_v32  ;;  %vm4185_vm0 = vcmp.lt.s32.totalorder %v3028_v40, 1100  ;;  %v613_v35 = vld [vmem:[%s2456_s5 + $0x1e8] sm:$0xff]  ;;  %v4191_v34 = vld [vmem:[#allocation39_spill] sm:$0xff] }
  0xd9   : > { %v4181_v50 = vsel %vm4180_vm12, %v2943_v15, 0  ;;  %v4184_v25 = vsel %vm4182_vm10, %v4183_v4, 0  ;;  %vm1915_vm11 = vmpackc.low %vm4048_vm1, %vm4185_vm0  ;;  %v1114_v62 = vsel %vm3120_vm7, %v986_v43, 0  ;;  %v1115_v37 = vsel %vm3136_vm9, %v987_v42, 0  ;;  %v565_v42 = vld [vmem:[%s2456_s5 + $0x68] sm:$0xff]  ;;  %v4195_v4 = vld [vmem:[#allocation18_spill] sm:$0xff] }
  0xda   : > { %v3289_v59 = vcombine.low %v4184_v25, %v4181_v50  ;;  %v1146_v32 = vsel %vm3188_vm2, %v1018_v57, 0  ;;  %v1147_v15 = vsel %vm3208_vm3, %v1019_v28, 0  ;;  %v4189_v49 = vpack.c.bf16 %v4187_v16, %v4188_v20  ;;  %v597_v57 = vld [vmem:[%s2456_s5 + $0x168] sm:$0xff]  ;;  %v4192_v28 = vld [vmem:[#allocation38_spill] sm:$0xff] }
  0xdb   : > { %v372_v5 = vadd.s32 104, %v2467_v2  ;;  %v3310_v9 = vadd.s32 %v2469_v3, %v371_v7  ;;  %v3312_v43 = vcombine.low %v1114_v62, %v1115_v37  ;;  %v3314_v46 = vcombine.low %v1146_v32, %v1147_v15 }
  0xdc   : > { %1916 = vmatpush3.bf16.msk.msra.mxu0 %vm1915_vm11, %v4189_v49  ;;  %v403_v31 = vadd.s32 352, %v2467_v2  ;;  %v404_v61 = vadd.s32 360, %v2467_v2  ;;  %vm4190_vm7 = vcmp.lt.s32.totalorder %v3067_v13, 1100  ;;  %vm4038_vm2 = vcmp.lt.s32.totalorder %v3128_v18, 1100 }
  0xdd   : > { %vm1963_vm9 = vmpackc.low %vm4042_vm4, %vm4190_vm7  ;;  %vm4036_vm3 = vcmp.lt.s32.totalorder %v4191_v34, 1100  ;;  %v1917_v7 = vpack.c.bf16 %v581_v53, %v580_v52  ;;  %v1965_v55 = vpack.c.bf16 %v613_v35, %v612_v38  ;;  %v4194_v27 = vpack.c.bf16 %v4192_v28, %v4193_v22 }
  0xde   : > { %vm4028_vm14 = vcmp.lt.s32.totalorder %v3173_v54, 1100  ;;  %v3333_v44 = vrot.slane %v3071_v63, %v301_v19  ;;  %v3336_v45 = vrot.slane %v3071_v63, %v309_v60  ;;  %vm4027_vm15 = vcmp.lt.s32.totalorder %v3196_v12, 1100  ;;  %vm1918_vm6 = vmpackc.low %vm4036_vm3, %vm4038_vm2 }
  0xdf   : > { %1964 = vmatpush3.bf16.msk.msra.mxu1 %vm1963_vm9, %v4194_v27  ;;  %v3340_v33 = vadd.s32 %v2469_v3, %v372_v5  ;;  %vm4031_vm13 = vcmp.lt.s32.totalorder %v3310_v9, 1100  ;;  %v1920_v52 = vpack.c.bf16 %v565_v42, %v564_v21  ;;  %v3348_v53 = vadd.s32 %v2469_v3, %v403_v31  ;;  %1919 = vmatprep.subr.msk.bf16.mxu0 %vm1918_vm6, %v1917_v7  ;;  %vm1966_vm7 = vmpackc.low %vm4027_vm15, %vm4028_vm14  ;;  %v582_v42 = vld [vmem:[%s2456_s5 + $0xf0] sm:$0xff]  ;;  %v583_v31 = vld [vmem:[%s2456_s5 + $0xf8] sm:$0xff] }
  0xe0   : > { %v3351_v19 = vadd.s32 %v2469_v3, %v404_v61  ;;  %v1968_v63 = vpack.c.bf16 %v597_v57, %v596_v23  ;;  %v389_v60 = vadd.s32 240, %v2467_v2  ;;  %v390_v11 = vadd.s32 248, %v2467_v2  ;;  %1967 = vmatprep.subr.msk.bf16.mxu1 %vm1966_vm7, %v1965_v55 }
  0xe1   : > { %v2247_v10 = vmov 0.0   ;;  %vm4049_vm12 = vcmp.eq.s32.totalorder %v3114_v36, %v4195_v4  ;;  %vm4037_vm10 = vcmp.eq.s32.totalorder %v3333_v44, %v4195_v4  ;;  %vm4050_vm0 = vcmp.eq.s32.totalorder %v3333_v44, %v2467_v2 }
  0xe2   : > { %v1622_v50 = vsel %vm4043_vm5, 1.0, %v2247_v10  ;;  %vm4047_vm11 = vcmp.eq.s32.totalorder %v3336_v45, %v2467_v2  ;;  %v1626_v25 = vsel %vm4049_vm12, 1.0, %v2247_v10  ;;  %v1625_v38 = vsel %vm4037_vm10, 1.0, %v2247_v10 }
  0xe3   : > { %vm4030_vm9 = vcmp.lt.s32.totalorder %v3340_v33, 1100  ;;  %vm4029_vm6 = vcmp.eq.s32.totalorder %v3336_v45, %v4195_v4  ;;  %v1621_v35 = vsel %vm4050_vm0, 1.0, %v2247_v10  ;;  %v1623_v62 = vsel %vm4047_vm11, 1.0, %v2247_v10 }
  0xe4   : > { %v421_v37 = vadd.s32 496, %v2467_v2  ;;  %v422_v32 = vadd.s32 504, %v2467_v2  ;;  %v341_v15 = vadd.f32 %v1622_v50, %v1621_v35  ;;  %v1627_v16 = vsel %vm4029_vm6, 1.0, %v2247_v10  ;;  %vm1921_vm7 = vmpackc.low %vm4030_vm9, %vm4031_vm13 }
  0xe5   : > { %v3391_v20 = vadd.s32 %v2469_v3, %v389_v60  ;;  %v3394_v49 = vadd.s32 %v2469_v3, %v390_v11  ;;  %v1624_v5 = vsel %vm4039_vm8, 1.0, %v2247_v10  ;;  %v346_v21 = vadd.f32 %v1626_v25, %v1625_v38  ;;  %1922 = vmatpush3.bf16.msk.msra.mxu0 %vm1921_vm7, %v1920_v52  ;;  %v614_v60 = vld [vmem:[%s2456_s5 + $0x1f0] sm:$0xff]  ;;  %v615_v11 = vld [vmem:[%s2456_s5 + $0x1f8] sm:$0xff] }
  0xe6   : > { %vm4033_vm15 = vcmp.lt.s32.totalorder %v3348_v53, 1100  ;;  %vm4032_vm14 = vcmp.lt.s32.totalorder %v3351_v19, 1100  ;;  %vm4044_vm6 = vcmp.eq.s32.totalorder %v3181_v8, %v4195_v4  ;;  %v342_v61 = vadd.f32 %v1623_v62, %v341_v15  ;;  %v566_v62 = vld [vmem:[%s2456_s5 + $0x70] sm:$0xff] }
  0xe7   : > { %v373_v7 = vadd.s32 112, %v2467_v2  ;;  %v374_v55 = vadd.s32 120, %v2467_v2  ;;  %v1628_v23 = vsel %vm4044_vm6, 1.0, %v2247_v10  ;;  %v347_v57 = vadd.f32 %v1627_v16, %v346_v21  ;;  %vm1969_vm7 = vmpackc.low %vm4032_vm14, %vm4033_vm15  ;;  %v599_v21 = vld [vmem:[%s2456_s5 + $0x178] sm:$0xff] }
  0xe8   : > { %v3415_v28 = vadd.s32 %v2469_v3, %v421_v37  ;;  %v3418_v22 = vadd.s32 %v2469_v3, %v422_v32  ;;  %v343_v27 = vadd.f32 %v1624_v5, %v342_v61  ;;  %vm4035_vm9 = vcmp.lt.s32.totalorder %v3391_v20, 1100  ;;  %1970 = vmatpush3.bf16.msk.msra.mxu1 %vm1969_vm7, %v1968_v63  ;;  %v567_v37 = vld [vmem:[%s2456_s5 + $0x78] sm:$0xff]  ;;  %v598_v5 = vld [vmem:[%s2456_s5 + $0x170] sm:$0xff]  ;;  %v3682_v61 = vld [vmem:[%s2462_s15 + $0x28] sm:$0xf] }
  0xe9   : > { %vm4034_vm13 = vcmp.lt.s32.totalorder %v3394_v49, 1100  ;;  %v1923_v52 = vpack.c.bf16 %v583_v31, %v582_v42  ;;  %v405_v10 = vadd.s32 368, %v2467_v2  ;;  %v406_v50 = vadd.s32 376, %v2467_v2  ;;  %v4196_v42 = vld [vmem:[#allocation21_spill] sm:$0xff]  ;;  %v4200_v31 = vld [vmem:[#allocation22_spill] sm:$0xff] }
  0xea   : > { %344 = vadd.xlane.f32.xlu0 %v343_v27  ;;  %v348_v25 = vadd.f32 %v1628_v23, %v347_v57  ;;  %v3431_v38 = vadd.s32 %v2469_v3, %v373_v7  ;;  %v3434_v35 = vadd.s32 %v2469_v3, %v374_v55  ;;  %vm1924_vm14 = vmpackc.low %vm4034_vm13, %vm4035_vm9  ;;  %vm4041_vm7 = vcmp.lt.s32.totalorder %v3415_v28, 1100  ;;  %v4204_v7 = vld [vmem:[#allocation25_spill] sm:$0xff]  ;;  %v4208_v57 = vld [vmem:[#allocation26_spill] sm:$0xff] }
  0xeb   : > { %vm4040_vm15 = vcmp.lt.s32.totalorder %v3418_v22, 1100  ;;  %v1971_v63 = vpack.c.bf16 %v615_v11, %v614_v60  ;;  %1925 = vmatprep.subr.msk.bf16.mxu0 %vm1924_vm14, %v1923_v52  ;;  %v3445_v32 = vadd.s32 %v2469_v3, %v405_v10  ;;  %v3448_v15 = vadd.s32 %v2469_v3, %v406_v50  ;;  %v4212_v52 = vld [vmem:[#allocation23_spill] sm:$0xff]  ;;  %v4216_v11 = vld [vmem:[#allocation24_spill] sm:$0xff]  ;;  %v4220_v50 = vld [vmem:[#allocation29_spill] sm:$0xff] }
  0xec   : > { %vm1972_vm13 = vmpackc.low %vm4040_vm15, %vm4041_vm7  ;;  %vm4046_vm9 = vcmp.lt.s32.totalorder %v3431_v38, 1100  ;;  %vm4045_vm3 = vcmp.lt.s32.totalorder %v3434_v35, 1100  ;;  %v1926_v16 = vpack.c.bf16 %v567_v37, %v566_v62  ;;  %vm4197_vm14 = vcmp.lt.s32.totalorder %v4196_v42, 1100  ;;  %v4228_v37 = vld [vmem:[#allocation28_spill] sm:$0xff]  ;;  %v4240_v42 = vld [vmem:[#allocation31_spill] sm:$0xff] }
  0xed   : > { %1973 = vmatprep.subr.msk.bf16.mxu1 %vm1972_vm13, %v1971_v63  ;;  %vm3461_vm10 = vmpackc.low %vm4197_vm14, %vm4197_vm14  ;;  %vm4201_vm2 = vcmp.lt.s32.totalorder %v4200_v31, 1100  ;;  %vm4205_vm15 = vcmp.lt.s32.totalorder %v4204_v7, 1100  ;;  %vm4052_vm14 = vcmp.lt.s32.totalorder %v3445_v32, 1100  ;;  %vm4051_vm4 = vcmp.lt.s32.totalorder %v3448_v15, 1100  ;;  %v4224_v63 = vld [vmem:[#allocation27_spill] sm:$0xff] }
  0xee   : > { %349 = vadd.xlane.f32.xlu0 %v348_v25  ;;  %vm3468_vm8 = vmpackc.low %vm4201_vm2, %vm4201_vm2  ;;  %v1974_v23 = vpack.c.bf16 %v599_v21, %v598_v5  ;;  %vm4209_vm2 = vcmp.lt.s32.totalorder %v4208_v57, 1100  ;;  %v4226_v62 = vmov 0  ;;  %v4232_v5 = vld [vmem:[#allocation30_spill] sm:$0xff]  ;;  %vm4236_vm0 = vcmp.lt.s32.totalorder %v2991_v58, 1100  ;;  %v4244_v58 = vld [vmem:[#allocation33_spill] sm:$0xff] }
  0xef   : > { %vm3475_vm7 = vmpackc.low %vm4205_vm15, %vm4205_vm15  ;;  %vm4213_vm15 = vcmp.lt.s32.totalorder %v4212_v52, 1100  ;;  %v4242_v31 = vmov 0  ;;  %v4246_v7 = vmov 0  ;;  %v4251_v57 = vld [vmem:[#allocation19_spill] sm:$0xff]  ;;  %v4253_v52 = vmov 0 }
  0xf0   : > { %vm1927_vm13 = vmpackc.low %vm4045_vm3, %vm4046_vm9  ;;  %vm4217_vm3 = vcmp.lt.s32.totalorder %v4216_v11, 1100  ;;  %v4263_v11 = vmov 0  ;;  %v3679_v3 = vld [vmem:[%s2462_s15 + $0xa4] sm:$0xf]  ;;  %v990_v27 = vld [vmem:[%s2462_s15 + $0x68] sm:$0xf] }
  0xf1   : > { %vm3488_vm5 = vmpackc.low %vm4209_vm2, %vm4209_vm2  ;;  %1928 = vmatpush3.bf16.msk.msra.mxu0 %vm1927_vm13, %v1926_v16  ;;  %vm4221_vm2 = vcmp.lt.s32.totalorder %v4220_v50, 1100  ;;  %vm4225_vm13 = vcmp.lt.s32.totalorder %v4224_v63, 1100  ;;  %v4230_v16 = vmov 0  ;;  %v989_v50 = vld [vmem:[%s2462_s15 + $0x64] sm:$0xf] }
  0xf2   : > { %vm3495_vm6 = vmpackc.low %vm4213_vm15, %vm4213_vm15  ;;  %1837 = vmatprep.subr.bf16.mxu0 %v3153_v29  ;;  %v1002_v63 = vld [vmem:[%s2462_s15 + $0x98] sm:$0xf]  ;;  %v1022_v10 = vld [vmem:[%s2462_s15 + $0xe8] sm:$0xf] }
  0xf3   : > { %vm3502_vm9 = vmpackc.low %vm4217_vm3, %vm4217_vm3  ;;  %vm4229_vm3 = vcmp.lt.s32.totalorder %v4228_v37, 1100  ;;  %v1003_v37 = vld [vmem:[%s2462_s15 + $0x9c] sm:$0xf]  ;;  %v1023_v29 = vld [vmem:[%s2462_s15 + $0xec] sm:$0xf] }
  0xf4   : > { %vm3509_vm11 = vmpackc.low %vm4221_vm2, %vm4221_vm2  ;;  %vm4233_vm2 = vcmp.lt.s32.totalorder %v4232_v5, 1100  ;;  %v1007_v21 = vld [vmem:[%s2462_s15 + $0xac] sm:$0xf] }
  0xf5   : > { %vm3517_vm15 = vmpackc.low %vm4225_vm13, %vm4225_vm13 }
  0xf6   : > { %v4227_v62 = vsel %vm3517_vm15, 4294967295, %v4226_v62  ;;  %vm3524_vm1 = vmpackc.low %vm4229_vm3, %vm4229_vm3 }
  0xf7   : > { %v4231_v16 = vsel %vm3524_vm1, 4294967295, %v4230_v16  ;;  %vm3531_vm12 = vmpackc.low %vm4233_vm2, %vm4233_vm2  ;;  %vm4239_vm2 = vcmp.eq.s32.totalorder %v3333_v44, %v2467_v2  ;;  %vm4241_vm1 = vcmp.lt.s32.totalorder %v4240_v42, 1100  ;;  %v972_v42 = vld [vmem:[%s2462_s15 + $0x20] sm:$0xf] }
  0xf8   : > { %vm1975_vm13 = vmpackc.low %vm4051_vm4, %vm4052_vm14  ;;  %1663 = vmatmul.mubr.msk.f32.vlgmr.msra.gmra.mrb[0].mxu0 %vm4239_vm2, %v2246_v0  ;;  %vm4245_vm4 = vcmp.lt.s32.totalorder %v4244_v58, 1100  ;;  %vm4255_vm14 = vcmp.lt.s32.totalorder %v3025_v17, 1100  ;;  %v970_v17 = vld [vmem:[%s2462_s15 + $0x18] sm:$0xf]  ;;  %v973_v58 = vld [vmem:[%s2462_s15 + $0x24] sm:$0xf] }
  0xf9   : > { %vm3542_vm3 = vmpackc.low %vm4236_vm0, %vm4236_vm0  ;;  %1976 = vmatpush3.bf16.msk.msra.mxu1 %vm1975_vm13, %v1974_v23  ;;  %vm4248_vm13 = vcmp.lt.s32.totalorder %v2994_v47, 1100  ;;  %v4249_v23 = vmov 0  ;;  %1838 = vmatpush3.bf16.msra.mxu0 %v4251_v57  ;;  %v4256_v47 = vmov 0  ;;  %v1117_v57 = vsel %vm3488_vm5, %v989_v50, 0  ;;  %v975_v50 = vld [vmem:[%s2462_s15 + $0x2c] sm:$0xf] }
  0xfa   : > { %vm3553_vm15 = vmpackc.low %vm4241_vm1, %vm4241_vm1  ;;  %1859 = vmatprep.subr.bf16.mxu1 %v3163_v30  ;;  %vm4252_vm1 = vcmp.lt.s32.totalorder %v3012_v51, 1100  ;;  %v4259_v30 = vmov 0  ;;  %1839 = vmatprep.subr.bf16.mxu0 %v3215_v39  ;;  %v971_v51 = vld [vmem:[%s2462_s15 + $0x1c] sm:$0xf]  ;;  %v988_v39 = vld [vmem:[%s2462_s15 + $0x60] sm:$0xf] }
  0xfb   : > { %v4243_v31 = vsel %vm3553_vm15, 4294967295, %v4242_v31  ;;  %vm3560_vm0 = vmpackc.low %vm4245_vm4, %vm4245_vm4  ;;  %vm4293_vm5 = vcmp.lt.s32.totalorder %v3196_v12, 1100  ;;  %v1101_v25 = vsel %vm3531_vm12, %v973_v58, 0  ;;  %vm4301_vm12 = vcmp.lt.s32.totalorder %v3340_v33, 1100 }
  0xfc   : > { %v4247_v7 = vsel %vm3560_vm0, 4294967295, %v4246_v7  ;;  %vm3567_vm2 = vmpackc.low %vm4248_vm13, %vm4248_vm13  ;;  %vm4258_vm0 = vcmp.lt.s32.totalorder %v3028_v40, 1100  ;;  %v4266_v40 = vld [vmem:[#allocation20_spill] sm:$0xff] }
  0xfd   : > { %v4250_v23 = vsel %vm3567_vm2, 4294967295, %v4249_v23  ;;  %vm3576_vm4 = vmpackc.low %vm4252_vm1, %vm4252_vm1  ;;  %vm4261_vm1 = vcmp.eq.s32.totalorder %v3114_v36, %v4195_v4  ;;  %1840 = vmatpush3.bf16.msra.mxu0 %v3240_v24 }
  0xfe   : > { %v4254_v52 = vsel %vm3576_vm4, 4294967295, %v4253_v52  ;;  %vm3583_vm13 = vmpackc.low %vm4255_vm14, %vm4255_vm14  ;;  %1664 = vmatprep.mubr.msk.f32.mxu0 %vm4261_vm1, %v2246_v0  ;;  %vm4262_vm14 = vcmp.lt.s32.totalorder %v4186_v41, 1100  ;;  %vm4267_vm1 = vcmp.eq.s32.totalorder %v3181_v8, %v4195_v4  ;;  %1841 = vmatprep.subr.bf16.mxu0 %v3267_v6  ;;  %v1116_v6 = vsel %vm3475_vm7, %v988_v39, 0 }
  0xff   : > { %v4257_v47 = vsel %vm3583_vm13, 4294967295, %v4256_v47  ;;  %vm3590_vm15 = vmpackc.low %vm4258_vm0, %vm4258_vm0  ;;  %vm4265_vm0 = vcmp.eq.s32.totalorder %v3336_v45, %v2467_v2  ;;  %v1100_v39 = vsel %vm3509_vm11, %v972_v42, 0  ;;  %vm4296_vm11 = vcmp.lt.s32.totalorder %v3310_v9, 1100 }
 0x100   : > { %v4260_v30 = vsel %vm3590_vm15, 4294967295, %v4259_v30  ;;  %vm3604_vm13 = vmpackc.low %vm4262_vm14, %vm4262_vm14  ;;  %1699 = vmatmul.mubr.msk.f32.vlgmr.msra.gmra.mrb[0].mxu1 %vm4265_vm0, %v2246_v0  ;;  %vm4268_vm14 = vcmp.eq.s32.totalorder %v3114_v36, %v2467_v2  ;;  %vm4272_vm0 = vcmp.lt.s32.totalorder %v3067_v13, 1100  ;;  %v1714_v41 = vcombine.low %v1116_v6, %v1117_v57  ;;  %v995_v6 = vld [vmem:[%s2462_s15 + $0x7c] sm:$0xf] }
 0x101   : > { %v4264_v11 = vsel %vm3604_vm13, 4294967295, %v4263_v11  ;;  %1860 = vmatpush3.bf16.msra.mxu1 %v4266_v40  ;;  %1700 = vmatprep.mubr.msk.f32.mxu1 %vm4267_vm1, %v2246_v0  ;;  %vm4269_vm13 = vcmp.eq.s32.totalorder %v3114_v36, %v4195_v4  ;;  %vm3634_vm15 = vmpackc.low %vm4272_vm0, %vm4272_vm0  ;;  %vm4275_vm1 = vcmp.lt.s32.totalorder %v3104_v26, 1100  ;;  %v4276_v36 = vmov 0  ;;  %v991_v40 = vld [vmem:[%s2462_s15 + $0x6c] sm:$0xf] }
 0x102   : > { %vm3625_vm4 = vmpackc.low %vm4269_vm13, %vm4268_vm14  ;;  %1861 = vmatprep.subr.bf16.mxu1 %v3230_v48  ;;  %vm4278_vm13 = vcmp.eq.s32.totalorder %v3181_v8, %v2467_v2  ;;  %vm4279_vm14 = vcmp.eq.s32.totalorder %v3181_v8, %v4195_v4  ;;  %v1098_v26 = vsel %vm3461_vm10, %v970_v17, 0  ;;  %v1099_v48 = vsel %vm3468_vm8, %v971_v51, 0  ;;  %v3676_v8 = vld [vmem:[%s2462_s15 + $0xa0] sm:$0xf]  ;;  %v1021_v51 = vld [vmem:[%s2462_s15 + $0xe4] sm:$0xf]  ;;  %1842 = vmatpush3.bf16.msra.mxu0 %v3279_v56 }
 0x103   : > { %vm3641_vm2 = vmpackc.low %vm4275_vm1, %vm4275_vm1  ;;  %vm4282_vm1 = vcmp.lt.s32.totalorder %v3128_v18, 1100  ;;  %vm4286_vm8 = vcmp.lt.s32.totalorder %v4191_v34, 1100  ;;  %v1020_v17 = vld [vmem:[%s2462_s15 + $0xe0] sm:$0xf]  ;;  %v2248_v34 = vmov 1.0|1.0   ;;  %v1705_v60 = vcombine.low %v1098_v26, %v1099_v48  ;;  %1843 = vmatprep.subr.bf16.mxu0 %v3312_v43 }
 0x104   : > { %v4277_v36 = vsel %vm3641_vm2, 4294967295, %v4276_v36  ;;  %vm3653_vm0 = vmpackc.low %vm4279_vm14, %vm4278_vm13  ;;  %vm4285_vm13 = vcmp.eq.s32.totalorder %v3333_v44, %v4195_v4  ;;  %vm4289_vm14 = vcmp.eq.s32.totalorder %v3336_v45, %v4195_v4  ;;  %v1118_v43 = vsel %vm3542_vm3, %v990_v27, 0  ;;  %v976_v48 = vld [vmem:[%s2462_s15 + $0x30] sm:$0xf]  ;;  %v1009_v27 = vld [vmem:[%s2462_s15 + $0xb4] sm:$0xf] }
 0x105   : > { %vm3666_vm2 = vmpackc.low %vm4282_vm1, %vm4282_vm1  ;;  %1665 = vmatmul.mubr.msk.f32.gmra.mrb[2].mxu0 %vm4285_vm13, %v2246_v0  ;;  %1701 = vmatmul.mubr.msk.f32.gmra.mrb[2].mxu1 %vm4289_vm14, %v2246_v0  ;;  %vm4290_vm1 = vcmp.lt.s32.totalorder %v3173_v54, 1100  ;;  %v1130_v0 = vsel %vm3495_vm6, %v1002_v63, 0  ;;  %v1131_v54 = vsel %vm3502_vm9, %v1003_v37, 0  ;;  %vm4299_vm6 = vnez %v4227_v62  ;;  %v1006_v63 = vld [vmem:[%s2462_s15 + $0xa8] sm:$0xf] }
 0x106   : > { %vm3687_vm10 = vmpackc.low %vm4286_vm8, %vm4286_vm8  ;;  %1735 = vmatprep.mubr.msk.bf16.mxu0 %vm3625_vm4, %v2248_v34  ;;  %1862 = vmatpush3.bf16.msra.mxu1 %v3250_v1  ;;  %vm4304_vm8 = vnez %v4250_v23  ;;  %v992_v37 = vld [vmem:[%s2462_s15 + $0x70] sm:$0xf]  ;;  %vm4305_vm14 = vnez %v4243_v31  ;;  %vm4308_vm3 = vcmp.lt.s32.totalorder %v3348_v53, 1100  ;;  %v1721_v31 = vcombine.low %v1130_v0, %v1131_v54 }
 0x107   : > { %vm3707_vm7 = vmpackc.low %vm4290_vm1, %vm4290_vm1  ;;  %1739 = vmatprep.mubr.msk.bf16.mxu1 %vm3653_vm0, %v2248_v34  ;;  %1863 = vmatprep.subr.bf16.mxu1 %v3269_v14  ;;  %v1148_v14 = vsel %vm4299_vm6, %v1020_v17, 0  ;;  %vm4300_vm0 = vnez %v4231_v16  ;;  %v1119_v62 = vsel %vm4304_vm8, %v991_v40, 0  ;;  %v993_v16 = vld [vmem:[%s2462_s15 + $0x74] sm:$0xf]  ;;  %v1132_v13 = vsel %vm4305_vm14, %v3676_v8, 0 }
 0x108   : > { %vm3727_vm4 = vmpackc.low %vm4293_vm5, %vm4293_vm5  ;;  %v1149_v56 = vsel %vm4300_vm0, %v1021_v51, 0  ;;  %vm4306_vm1 = vnez %v4247_v7  ;;  %vm4307_vm5 = vnez %v4260_v30  ;;  %v977_v7 = vld [vmem:[%s2462_s15 + $0x34] sm:$0xf]  ;;  %vm4311_vm6 = vcmp.lt.s32.totalorder %v3351_v19, 1100  ;;  %1844 = vmatpush3.bf16.msra.mxu0 %v1705_v60  ;;  %v1024_v19 = vld [vmem:[%s2462_s15 + $0xf0] sm:$0xf] }
 0x109   : > { %vm3739_vm9 = vmpackc.low %vm4296_vm11, %vm4296_vm11  ;;  %v1133_v33 = vsel %vm4306_vm1, %v3679_v3, 0  ;;  %v1102_v26 = vsel %vm4307_vm5, %v3682_v61, 0  ;;  %v1730_v53 = vcombine.low %v1148_v14, %v1149_v56  ;;  %v1706_v42 = vcombine.low %v1100_v39, %v1101_v25  ;;  %1845 = vmatprep.subr.bf16.mxu0 %v1714_v41  ;;  %v1025_v61 = vld [vmem:[%s2462_s15 + $0xf4] sm:$0xf]  ;;  %v1008_v17 = vld [vmem:[%s2462_s15 + $0xb0] sm:$0xf] }
 0x10a   : > { %vm3753_vm13 = vmpackc.low %vm4301_vm12, %vm4301_vm12  ;;  %1864 = vmatpush3.bf16.msra.mxu1 %v3289_v59  ;;  %vm4314_vm12 = vnez %v4254_v52  ;;  %vm4315_vm8 = vnez %v4257_v47  ;;  %vm4316_vm14 = vnez %v4264_v11  ;;  %vm4317_vm1 = vcmp.lt.s32.totalorder %v3391_v20, 1100  ;;  %v994_v11 = vld [vmem:[%s2462_s15 + $0x78] sm:$0xf]  ;;  %v1027_v25 = vld [vmem:[%s2462_s15 + $0xfc] sm:$0xf] }
 0x10b   : > { %vm3776_vm11 = vmpackc.low %vm4308_vm3, %vm4308_vm3  ;;  %1865 = vmatprep.subr.bf16.mxu1 %v3314_v46  ;;  %v1150_v59 = vsel %vm4314_vm12, %v1022_v10, 0  ;;  %v1151_v58 = vsel %vm4315_vm8, %v1023_v29, 0  ;;  %v1103_v8 = vsel %vm4316_vm14, %v975_v50, 0  ;;  %v1715_v3 = vcombine.low %v1118_v43, %v1119_v62  ;;  %v979_v50 = vld [vmem:[%s2462_s15 + $0x3c] sm:$0xf] }
 0x10c   : > { %vm3786_vm0 = vmpackc.low %vm4311_vm6, %vm4311_vm6  ;;  %v1120_v52 = vsel %vm3666_vm2, %v992_v37, 0  ;;  %v1121_v47 = vsel %vm3687_vm10, %v993_v16, 0  ;;  %vm4320_vm3 = vcmp.lt.s32.totalorder %v3394_v49, 1100  ;;  %v1134_v57 = vsel %vm3634_vm15, %v1006_v63, 0  ;;  %1846 = vmatpush3.bf16.msra.mxu0 %v1706_v42  ;;  %v1010_v29 = vld [vmem:[%s2462_s15 + $0xb8] sm:$0xf] }
 0x10d   : > { %vm3801_vm5 = vmpackc.low %vm4317_vm1, %vm4317_vm1  ;;  %vm4323_vm12 = vnez %v4277_v36  ;;  %vm4324_vm2 = vcmp.lt.s32.totalorder %v3415_v28, 1100  ;;  %v1722_v18 = vcombine.low %v1132_v13, %v1133_v33  ;;  %v1731_v51 = vcombine.low %v1150_v59, %v1151_v58  ;;  %v978_v36 = vld [vmem:[%s2462_s15 + $0x38] sm:$0xf]  ;;  %1847 = vmatprep.subr.bf16.mxu0 %v1715_v3  ;;  %v1011_v37 = vld [vmem:[%s2462_s15 + $0xbc] sm:$0xf] }
 0x10e   : > { %vm3813_vm6 = vmpackc.low %vm4320_vm3, %vm4320_vm3  ;;  %v1135_v24 = vsel %vm4323_vm12, %v1007_v21, 0  ;;  %1866 = vmatpush3.bf16.msra.mxu1 %v1721_v31  ;;  %vm4327_vm8 = vcmp.lt.s32.totalorder %v3418_v22, 1100  ;;  %v1707_v28 = vcombine.low %v1102_v26, %v1103_v8  ;;  %v1716_v40 = vcombine.low %v1120_v52, %v1121_v47  ;;  %v339_v31 = vld [vmem:[#allocation4] sm:$0xff] }
 0x10f   : > { %vm3827_vm10 = vmpackc.low %vm4324_vm2, %vm4324_vm2  ;;  %1867 = vmatprep.subr.bf16.mxu1 %v1730_v53  ;;  %v1152_v0 = vsel %vm3707_vm7, %v1024_v19, 0  ;;  %v1153_v54 = vsel %vm3727_vm4, %v1025_v61, 0  ;;  %v1104_v22 = vsel %vm3739_vm9, %v976_v48, 0  ;;  %v1105_v39 = vsel %vm3753_vm13, %v977_v7, 0  ;;  %v808_v19 = vld [vmem:[#allocation2] sm:$0xff] }
 0x110   : > { %vm3835_vm15 = vmpackc.low %vm4327_vm8, %vm4327_vm8  ;;  %vm4330_vm14 = vcmp.lt.s32.totalorder %v3431_v38, 1100  ;;  %v1122_v55 = vsel %vm3801_vm5, %v994_v11, 0  ;;  %v1123_v1 = vsel %vm3813_vm6, %v995_v6, 0  ;;  %vm4333_vm7 = vcmp.lt.s32.totalorder %v3434_v35, 1100  ;;  %v1026_v38 = vld [vmem:[%s2462_s15 + $0xf8] sm:$0xf]  ;;  %1848 = vmatpush3.bf16.msra.mxu0 %v1707_v28 }
 0x111   : > { %vm3852_vm1 = vmpackc.low %vm4330_vm14, %vm4330_vm14  ;;  %v1723_v12 = vcombine.low %v1134_v57, %v1135_v24  ;;  %v1732_v41 = vcombine.low %v1152_v0, %v1153_v54  ;;  %v1136_v14 = vsel %vm3776_vm11, %v1008_v17, 0  ;;  %v1137_v56 = vsel %vm3786_vm0, %v1009_v27, 0  ;;  %1849 = vmatprep.subr.bf16.mxu0 %v1716_v40  ;;  %v809_v11 = vld [vmem:[#allocation2 + $0x8] sm:$0xff]  ;;  %v1156_v0 = vld [vmem:[#allocation3] sm:$0xff] }
 0x112   : > { %vm3863_vm4 = vmpackc.low %vm4333_vm7, %vm4333_vm7  ;;  %1868 = vmatpush3.bf16.msra.mxu1 %v1722_v18  ;;  %vm4336_vm9 = vcmp.lt.s32.totalorder %v3445_v32, 1100  ;;  %v1708_v63 = vcombine.low %v1104_v22, %v1105_v39  ;;  %v1717_v9 = vcombine.low %v1122_v55, %v1123_v1  ;;  %v1106_v43 = vsel %vm3852_vm1, %v978_v36, 0 }
 0x113   : > { %vm3877_vm13 = vmpackc.low %vm4336_vm9, %vm4336_vm9  ;;  %1869 = vmatprep.subr.bf16.mxu1 %v1731_v51  ;;  %v1107_v62 = vsel %vm3863_vm4, %v979_v50, 0  ;;  %vm4339_vm11 = vcmp.lt.s32.totalorder %v3448_v15, 1100  ;;  %v1154_v32 = vsel %vm3827_vm10, %v1026_v38, 0  ;;  %v1155_v16 = vsel %vm3835_vm15, %v1027_v25, 0  ;;  %v1157_v50 = vld [vmem:[#allocation3 + $0x8] sm:$0xff] }
 0x114   : > { %vm1075_vm0 = vmpackc.low %vm4339_vm11, %vm4339_vm11  ;;  %v1724_v13 = vcombine.low %v1136_v14, %v1137_v56  ;;  %v1138_v33 = vsel %vm3877_vm13, %v1010_v29, 0  ;;  %1850 = vmatpush3.bf16.msra.mxu0 %v1708_v63  ;;  %v1733_v21 = vcombine.low %v1154_v32, %v1155_v16  ;;  %v1709_v23 = vcombine.low %v1106_v43, %v1107_v62 }
 0x115   : > { %v1139_v26 = vsel %vm1075_vm0, %v1011_v37, 0  ;;  %1851 = vmatprep.subr.bf16.mxu0 %v1717_v9  ;;  %vm4340_vm5 = vcmp.eq.s32.totalorder %v3333_v44, %v2467_v2  ;;  %vm4341_vm3 = vcmp.eq.s32.totalorder %v3333_v44, %v4195_v4  ;;  %vm4342_vm12 = vcmp.eq.s32.totalorder %v3336_v45, %v2467_v2  ;;  %v340_v44 = vld [vmem:[#allocation4 + $0x8] sm:$0xff] }
 0x116   : > { %1870 = vmatpush3.bf16.msra.mxu1 %v1723_v12  ;;  %v1725_v15 = vcombine.low %v1138_v33, %v1139_v26  ;;  %vm1736_vm6 = vmpackc.low %vm4341_vm3, %vm4340_vm5  ;;  %vm4343_vm2 = vcmp.eq.s32.totalorder %v3336_v45, %v4195_v4  ;;  %vm353_vm8 = vcmask 7168   ;;  %v2249_v25 = vmov (!%p1742_p4), 0  }
 0x117   : > { %1871 = vmatprep.subr.bf16.mxu1 %v1732_v41  ;;  %vm1740_vm10 = vmpackc.low %vm4343_vm2, %vm4342_vm12  ;;  %2049 = vset.pattern.permute.xlu0 (!%p1742_p4), %v2249_v25 }
 0x118   : > { %1852 = vmatpush3.bf16.msra.mxu0 %v1709_v23 }
 0x11a   : > { %1872 = vmatpush3.bf16.msra.mxu1 %v1724_v13 }
 0x11b   : > { %1873 = vmatprep.subr.bf16.mxu1 %v1733_v21  ;;  %1737 = vmatmul.mubr.msk.bf16.vlgmr.msra.gmra.mrb[4].mxu0 %vm1736_vm6, %v2248_v34 }
 0x11e   : > { %1874 = vmatpush3.bf16.msra.mxu1 %v1725_v15 }
 0x121   : > { %1741 = vmatmul.mubr.msk.bf16.vlgmr.msra.gmra.mrb[4].mxu1 %vm1740_vm10, %v2248_v34 }
 0x177   : > { %v345_v48 = vpop.xlane.xlu0 %344 }
 0x178   : > { %v351_v7 = vadd.f32 %v345_v48, %v339_v31 }
 0x17a   : > { %354 = vst.msk [vmem:[#allocation4] sm:$0xff] %vm353_vm8, %v351_v7 }
 0x17b   : > { %v350_v30 = vpop.xlane.xlu0 %349 }
 0x17c   : > { %v352_v53 = vadd.f32 %v350_v30, %v340_v44 }
 0x17e   : > { %355 = vst.msk [vmem:[#allocation4 + $0x8] sm:$0xff] %vm353_vm8, %v352_v53 }
 0x181   : > { %v1440_v10 = vld [vmem:[#allocation4] sm:$0xff] (!%p1742_p4) }
 0x182   : > { %v1442_v12 = vmax.f32 (!%p1742_p4), %v1440_v10, 1.0 }
 0x184   : > { %2050 = vrcp.f32 (!%p1742_p4), %v1442_v12 }
 0x185   : > { %v1441_v38 = vld [vmem:[#allocation4 + $0x8] sm:$0xff] (!%p1742_p4) }
 0x186   : > { %v1443_v41 = vmax.f32 (!%p1742_p4), %v1441_v38, 1.0 }
 0x188   : > { %2052 = vrcp.f32 (!%p1742_p4), %v1443_v41 }
 0x18e   : > { %v2051_v14 = vpop.eup (!%p1742_p4), %2050 }
 0x18f   : > { %1452 = vperm.xlu0 (!%p1742_p4), %2049, %v2051_v14  }
 0x192   : > { %v2053_v56 = vpop.eup (!%p1742_p4), %2052 }
 0x193   : > { %1457 = vperm.xlu0 (!%p1742_p4), %2049, %v2053_v56  }
 0x1cb   : > { %v1793_v42 = vpop.f32.mrb[0].mxu0 }
 0x1cc   : > { %v1794_v2 = vpop.f32.mrb[1].mxu0 }
 0x1cd   : > { %v1795_v59 = vadd.f32 %v1794_v2, %v1793_v42 }
 0x1d3   : > { %v1831_v58 = vpop.f32.mrb[0].mxu1 }
 0x1d4   : > { %v1832_v45 = vpop.f32.mrb[1].mxu1 }
 0x1d5   : > { %v1833_v4 = vadd.f32 %v1832_v45, %v1831_v58 }
 0x1d7   : > { %v952_v46 = vadd.f32 %v1833_v4, %v1795_v59 }
 0x1d8   : > { %v1796_v8 = vpop.f32.mrb[2].mxu0  ;;  %v1834_v3 = vpop.f32.mrb[2].mxu1 }
 0x1d9   : > { %v1797_v34 = vpop.f32.mrb[3].mxu0  ;;  %v1835_v47 = vpop.f32.mrb[3].mxu1  ;;  %v960_v61 = vadd.f32 %v952_v46, %v808_v19 }
 0x1da   : > { %v1798_v52 = vadd.f32 %v1797_v34, %v1796_v8  ;;  %v1836_v20 = vadd.f32 %v1835_v47, %v1834_v3 }
 0x1db   : > { %962 = vst [vmem:[#allocation2] sm:$0xff] %v960_v61 }
 0x1dc   : > { %v957_v6 = vadd.f32 %v1836_v20, %v1798_v52 }
 0x1de   : > { %v961_v57 = vadd.f32 %v957_v6, %v809_v11 }
 0x1e0   : > { %963 = vst [vmem:[#allocation2 + $0x8] sm:$0xff] %v961_v57 }
 0x1e2   : > { %v1448_v29 = vld [vmem:[#allocation2] sm:$0xff] (!%p1742_p4) }
 0x1e7   : > { %v1449_v43 = vld [vmem:[#allocation2 + $0x8] sm:$0xff] (!%p1742_p4) }
 0x1ee   : > { %v1853_v24 = vpop.f32.mrb[4].mxu0 }
 0x1ef   : > { %v1854_v17 = vpop.f32.mrb[5].mxu0 }
 0x1f0   : > { %v1855_v49 = vadd.f32 %v1854_v17, %v1853_v24  ;;  %v1856_v18 = vpop.f32.mrb[6].mxu0 }
 0x1f1   : > { %v1857_v27 = vpop.f32.mrb[7].mxu0 }
 0x1f2   : > { %v1858_v36 = vadd.f32 %v1857_v27, %v1856_v18 }
 0x1f4   : > { %v1875_v51 = vpop.f32.mrb[4].mxu1 }
 0x1f5   : > { %v1876_v5 = vpop.f32.mrb[5].mxu1 }
 0x1f6   : > { %v1877_v28 = vadd.f32 %v1876_v5, %v1875_v51  ;;  %v1878_v40 = vpop.f32.mrb[6].mxu1 }
 0x1f7   : > { %v1879_v54 = vpop.f32.mrb[7].mxu1 }
 0x1f8   : > { %v1426_v22 = vadd.f32 %v1877_v28, %v1855_v49  ;;  %v1880_v39 = vadd.f32 %v1879_v54, %v1878_v40  ;;  %1439 = sbr.rel (%p1742_p4) target bundleno = 536 (0x218), region = 52 }
 0x1fa   : > { %v1432_v60 = vadd.f32 %v1426_v22, %v1156_v0  ;;  %v1429_v55 = vadd.f32 %v1880_v39, %v1858_v36 }
 0x1fc   : > { %1434 = vst [vmem:[#allocation3] sm:$0xff] %v1432_v60  ;;  %v1433_v1 = vadd.f32 %v1429_v55, %v1157_v50 }
 0x1fe   : > { %1435 = vst [vmem:[#allocation3 + $0x8] sm:$0xff] %v1433_v1 }
 0x203   : > { %v1464_v9 = vld [vmem:[#allocation3] sm:$0xff] }
 0x205   : > { %v1465_v62 = vld [vmem:[#allocation3 + $0x8] sm:$0xff] }
 0x20e   : > { %v1453_v35 = vpop.permute.xlu0 %1452 }
 0x20f   : > { %v1460_v63 = vmul.f32 %v1453_v35, %v1448_v29  ;;  %v1466_v32 = vmul.f32 %v1464_v9, %v1453_v35 }
 0x211   : > { %1462 = vst [vmem:[#allocation11] sm:$0xff] %v1460_v63 }
 0x212   : > { %v1458_v37 = vpop.permute.xlu0 %1457 }
 0x213   : > { %v1461_v16 = vmul.f32 %v1458_v37, %v1449_v43  ;;  %v1467_v13 = vmul.f32 %v1465_v62, %v1458_v37 }
 0x215   : > { %1463 = vst [vmem:[#allocation11 + $0x8] sm:$0xff] %v1461_v16  ;;  %v1759_v33 = vpack.c.bf16 %v1467_v13, %v1466_v32 }
 0x217   : > { %1760 = vst [vmem:[#allocation12] sm:$0xff] %v1759_v33  }
 0x218 PF: > { %p1997_p8 = scmp.eq.s32.totalorder %s2300_s19, 2  ;;  %s2250_s7 = smov [#allocation11]  }
 0x219   : > { %s1484_s8 = sshll.u32 %s2250_s7, 4  ;;  %s1485_s8 = int_to_ptr.vmem [resolvable:$true] %s1484_s8 }
 0x21a   : > { %s2138_s11 = scalar_lea.vmem %s1485_s8, 256  ;;  %p2145_p0 = scmp.lt.s32.totalorder %s1485_s8, %s1485_s8 }
 0x21b   : > { %p2139_p9 = scmp.ne.s32.totalorder %s1485_s8, %s2138_s11  ;;  %p2146_p2 = scmp.lt.s32.totalorder %s2138_s11, %s2138_s11 }
 0x21d   : > { %p2140_p12 = pnand %p2139_p9, %p1997_p8  ;;  %p2147_p3 = por %p2146_p2, %p2145_p0 }
 0x21f   : > { %p2141_p10 = pneg %p2140_p12 }
 0x221   : > { %p2148_p7 = pnand %p2147_p3, %p2141_p10 }
 0x223   : > { %2151 = shalt.err (!%p2148_p7)
}
 0x224   : > { %s2152_s14 = scalar_lea.hbm %s3971_s3, 256 }
 0x225   : > { %p2153_p6 = scmp.ne.s32.totalorder %s3971_s3, %s2152_s14  ;;  %p2158_p5 = scmp.lt.u32.totalorder %s2152_s14, %s3971_s3 }
 0x227   : > { %p2154_p11 = pnand %p2153_p6, %p1997_p8 }
 0x229   : > { %p2155_p13 = pneg %p2154_p11 }
 0x22b   : > { %p2160_p1 = pnand %p2158_p5, %p2155_p13 }
 0x22d   : > { %2163 = shalt.err (!%p2160_p1)
}
 0x22e   : > { %s2251_s9 = smov 128   ;;  %s2252_s28 = smov 8  }
 0x22f   : > { %1984 = dma.vmem_to_hbm [thread:$0]  (%p1997_p8), %s1485_s8, 256, %s3971_s3, [#allocation7], %s2251_s9, %s2251_s9, %s2252_s28  }
 0x230   : > { %s2253_s15 = smov [#allocation12]  }
 0x231   : > { %s1497_s25 = sshll.u32 %s2253_s15, 4  ;;  %s1498_s25 = int_to_ptr.vmem [resolvable:$true] %s1497_s25 }
 0x232   : > { %s2164_s22 = scalar_lea.vmem %s1498_s25, 128  ;;  %p2171_p10 = scmp.lt.s32.totalorder %s1498_s25, %s1498_s25 }
 0x233   : > { %p2165_p4 = scmp.ne.s32.totalorder %s1498_s25, %s2164_s22  ;;  %p2172_p0 = scmp.lt.s32.totalorder %s2164_s22, %s2164_s22 }
 0x235   : > { %p2166_p9 = pnand %p2165_p4, %p1997_p8  ;;  %p2173_p2 = por %p2172_p0, %p2171_p10 }
 0x237   : > { %p2167_p12 = pneg %p2166_p9 }
 0x239   : > { %p2174_p3 = pnand %p2173_p2, %p2167_p12 }
 0x23b   : > { %2177 = shalt.err (!%p2174_p3)
}
 0x23c   : > { %s2178_s6 = scalar_lea.hbm %s3972_s4, 128 }
 0x23d   : > { %p2179_p7 = scmp.ne.s32.totalorder %s3972_s4, %s2178_s6  ;;  %p2184_p13 = scmp.lt.u32.totalorder %s2178_s6, %s3972_s4 }
 0x23f   : > { %p2180_p6 = pnand %p2179_p7, %p1997_p8 }
 0x241   : > { %p2181_p11 = pneg %p2180_p6 }
 0x243   : > { %p2186_p5 = pnand %p2184_p13, %p2181_p11 }
 0x245   : > { %2189 = shalt.err (!%p2186_p5)
}
 0x246   : > { %s2254_s12 = smov 64   ;;  %s2255_s13 = smov 4  }
 0x247   : > { %1986 = dma.vmem_to_hbm [thread:$0]  (%p1997_p8), %s1498_s25, 128, %s3972_s4, [#allocation13], %s2254_s12, %s2254_s12, %s2255_s13  }
 0x248   : > { %2215 = dma.done.wait (%p1997_p8), [#allocation7], 256  }
 0x249   : > { %2217 = vsyncadd (%p1997_p8), [#allocation7], 4294967040 }
 0x24a   : > { %2219 = dma.done.wait (%p1997_p8), [#allocation13], 128  }
 0x24b   : > { %2221 = vsyncadd (%p1997_p8), [#allocation13], 4294967168 }
 0x24c PF: > { %p18_p1 = scmp.ge.s32.totalorder %s2303_s20, 5   ;;  %s4344_s15 = smov %s2228_s16 }
 0x24d   : > { %s4345_s16 = smov %s2232_s17  ;;  %s4346_s17 = smov %s2313_s23 }
 0x24e   : > { %s4347_s18 = smov %s2303_s20  ;;  %20 = sbr.rel (!%p18_p1) target bundleno = 6 (0x6), region = 102 }
 0x255   :  { %1517 = vsyncpa [#allocation6], 1 }
 0x256   :  { %1519 = vsyncpa [#allocation6 + $0x1], 1 }
 0x257   :  { %1520 = vsyncpa [#allocation9], 1 }
 0x258   :  { %1522 = vsyncpa [#allocation9 + $0x1], 1 }
 0x259   :  { %1523 = vsyncpa [#allocation7], 1 }
 0x25a   :  { %1525 = vsyncpa [#allocation7 + $0x1], 1 }
 0x25b   :  { %1526 = vsyncpa [#allocation13], 1 }

</bundles_post_ra>
